<compile_context>
chip_gen: v7x
topology: tpu7x:2x2x1
jax: 0.10.0
libtpu: 0.0.40
codegen_flags: <defaults>
</compile_context>

<pallas_src>
import functools

import jax
import jax.numpy as jnp
from jax.experimental import pallas as pl
from jax.experimental.pallas import tpu as pltpu

LANE = 128     # vreg lane width
SUBLANE = 8    # f32 sublane tile


def _round_up(x, m):
    return (x + m - 1) // m * m


# ----------------------------- fused kernel ---------------------------------
def make_fused_kernel(T, Bp):
    """input-proj -> unrolled LSTM recurrence -> FC, all in one invocation.

    Refs (all full blocks, resident in VMEM):
      x_ref   : (T*Bp, Ep)  bf16  time-major, batch padded to sublane tile
      wih_ref : (Ep, 4*Hp)  bf16  input->gates weights (per-gate lane padding)
      whh_ref : (Hp, 4*Hp)  bf16  hidden->gates weights
      b_ref   : (1, 4*Hp)   f32   b_ih + b_hh
      wfc_ref : (Hp, Vp)    bf16  fc weight
      bfc_ref : (1, Vp)     f32   fc bias
      out_ref : (T*Bp, Vp)  f32   logits, time-major, lane-dense
    """

    def kernel(x_ref, wih_ref, whh_ref, b_ref, wfc_ref, bfc_ref, out_ref):
        Hp = whh_ref.shape[0]

        # 1) Input projection hoisted out of the recurrence: ONE bf16 MXU call
        #    for all T*Bp rows, f32 accumulation; bias broadcast happens once.
        gx = (jnp.dot(x_ref[...], wih_ref[...],
                      preferred_element_type=jnp.float32)
              + b_ref[...])                                        # (T*Bp, 4Hp) f32

        whh = whh_ref[...]                                         # bf16 (Hp, 4Hp)
        h = jnp.zeros((Bp, Hp), jnp.float32)
        c = jnp.zeros((Bp, Hp), jnp.float32)
        hs = []

        # 2) Recurrence: statically unrolled (T small & static); h/c stay in
        #    vregs, only h @ W_hh remains on the serial path.  Bp == 8 makes
        #    every gx slice a full (8,128)-tile-aligned slice (no XLU, no
        #    masked stores).  Elementwise math stays f32 (v5e-friendly).
        for t in range(T):
            gates = gx[t * Bp:(t + 1) * Bp, :] + jnp.dot(
                h.astype(jnp.bfloat16), whh,
                preferred_element_type=jnp.float32)                # (Bp, 4Hp) f32
            # Hp is a multiple of 128 -> each gate slice is a full-lane slice.
            i_g = jax.nn.sigmoid(gates[:, 0 * Hp:1 * Hp])
            f_g = jax.nn.sigmoid(gates[:, 1 * Hp:2 * Hp])
            g_g = jnp.tanh(gates[:, 2 * Hp:3 * Hp])
            o_g = jax.nn.sigmoid(gates[:, 3 * Hp:4 * Hp])
            c = f_g * c + i_g * g_g
            h = o_g * jnp.tanh(c)
            hs.append(h)                                           # 1 vreg each

        # 3) Fused FC epilogue: hidden history kept in vregs (no VMEM scratch
        #    round trip), one matmul over all T*Bp rows, written lane-dense
        #    (Vp multiple of 128) straight into the output block.
        h_all = jnp.concatenate(hs, axis=0)                        # (T*Bp, Hp) f32
        out_ref[...] = (jnp.dot(h_all.astype(jnp.bfloat16), wfc_ref[...],
                                preferred_element_type=jnp.float32)
                        + bfc_ref[...])

    return kernel


def lstm_fc_fused(x_tm, wih_p, whh_p, b_p, wfc_p, bfc_p, T, Bp):
    """x_tm: (T*Bp, Ep) bf16 time-major flat.  Returns logits (T*Bp, Vp) f32."""
    TBp, Ep = x_tm.shape
    Hp = whh_p.shape[0]
    Vp = wfc_p.shape[1]
    return pl.pallas_call(
        make_fused_kernel(T, Bp),
        out_shape=jax.ShapeDtypeStruct((TBp, Vp), jnp.float32),
        grid_spec=pltpu.PrefetchScalarGridSpec(
            num_scalar_prefetch=0,
            grid=(1,),  # single invocation: everything fits VMEM comfortably
            in_specs=[
                pl.BlockSpec((TBp, Ep), lambda i: (0, 0)),
                pl.BlockSpec((Ep, 4 * Hp), lambda i: (0, 0)),
                pl.BlockSpec((Hp, 4 * Hp), lambda i: (0, 0)),
                pl.BlockSpec((1, 4 * Hp), lambda i: (0, 0)),
                pl.BlockSpec((Hp, Vp), lambda i: (0, 0)),
                pl.BlockSpec((1, Vp), lambda i: (0, 0)),
            ],
            out_specs=pl.BlockSpec((TBp, Vp), lambda i: (0, 0)),
        ),
        compiler_params=pltpu.CompilerParams(
            dimension_semantics=("arbitrary",)),  # recurrence is sequential
    )(x_tm, wih_p, whh_p, b_p, wfc_p, bfc_p)


# ------------------------- parameter lane-padding ----------------------------
def pad_params(params, E, H, V):
    """Pad E/H/V up to 128 lanes (one-time) and cast MXU weights to bf16.
    Zero padding is exactly neutral: padded gate cols are 0 -> i=f=o=0.5, g=0
    -> padded h/c lanes stay 0; padded w_ih/w_hh rows and w_fc rows/cols are 0,
    so logits[:, :V] are exact up to bf16 operand rounding."""
    Ep = _round_up(E, LANE)
    Hp = _round_up(H, LANE)
    Vp = _round_up(V, LANE)

    def pad_gates(w, rows_to):  # (rows, 4H) -> (rows_to, 4*Hp), per-gate lane pad
        rows = w.shape[0]
        wp = jnp.zeros((rows_to, 4, Hp), jnp.float32)
        wp = wp.at[:rows, :, :H].set(w.reshape(rows, 4, H))
        return wp.reshape(rows_to, 4 * Hp)

    wih_p = pad_gates(params["w_ih"], Ep).astype(jnp.bfloat16)       # (Ep, 4Hp)
    whh_p = pad_gates(params["w_hh"], Hp).astype(jnp.bfloat16)       # (Hp, 4Hp)
    b_p = pad_gates(params["b_lstm"], 1)                             # (1, 4Hp) f32
    wfc_p = jnp.zeros((Hp, Vp), jnp.float32).at[:H, :V].set(
        params["w_fc"]).astype(jnp.bfloat16)                         # (Hp, Vp)
    bfc_p = jnp.zeros((1, Vp), jnp.float32).at[:, :V].set(params["b_fc"])
    return {"embed": params["embed"], "wih_p": wih_p, "whh_p": whh_p,
            "b_p": b_p, "wfc_p": wfc_p, "bfc_p": bfc_p}


# ------------------------------ full forward --------------------------------
def decoder_forward(kparams, features, captions, vocab_size):
    """
    features: (B, E) float32   (matches features.view(B, 1, -1) in PyTorch)
    captions: (B, T) int32
    returns:  (B, T, V) logits  (fc applied to y[:, :-1, :])
    """
    B, T = captions.shape
    Bp = _round_up(B, SUBLANE)
    Ep = kparams["wih_p"].shape[0]
    E = features.shape[-1]

    # TODO(synk): at realistic E/V, fuse the embedding gather into the kernel
    # (scalar-prefetched captions + row-gather BlockSpec) and let the consumer
    # accept time-major logits so the transpose below disappears; at these toy
    # shapes both are noise.
    emb_cap = jnp.take(kparams["embed"], captions, axis=0)            # (B, T, E)
    # LSTM input has T+1 steps (features + T embeddings), but fc consumes
    # y[:, :-1, :]  =>  only the first T recurrence steps are ever needed.
    x_used = jnp.concatenate([features[:, None, :], emb_cap[:, :T - 1, :]],
                             axis=1)                                  # (B, T, E)
    # time-major, batch padded to the sublane tile, E padded to full lanes;
    # padded rows/lanes are zero (exactly neutral) and sliced off below.
    x_tm = jnp.zeros((T, Bp, Ep), jnp.float32)
    x_tm = x_tm.at[:, :B, :E].set(jnp.transpose(x_used, (1, 0, 2)))
    x_tm = x_tm.reshape(T * Bp, Ep).astype(jnp.bfloat16)

    out = lstm_fc_fused(x_tm, kparams["wih_p"], kparams["whh_p"], kparams["b_p"],
                        kparams["wfc_p"], kparams["bfc_p"], T, Bp)    # (T*Bp, Vp)
    Vp = out.shape[-1]
    logits = jnp.transpose(out.reshape(T, Bp, Vp), (1, 0, 2))[:B, :, :vocab_size]
    return logits                                                     # (B, T, V)


# ------------------------- pure-JAX reference --------------------------------
def decoder_reference(params, features, captions):
    B, T = captions.shape
    emb_cap = jnp.take(params["embed"], captions, axis=0)
    x = jnp.concatenate([features[:, None, :], emb_cap], axis=1)      # (B, T+1, E)
    H = params["w_hh"].shape[0]

    def step(carry, x_t):
        h, c = carry
        gates = x_t @ params["w_ih"] + h @ params["w_hh"] + params["b_lstm"][0]
        i_g = jax.nn.sigmoid(gates[:, 0 * H:1 * H])
        f_g = jax.nn.sigmoid(gates[:, 1 * H:2 * H])
        g_g = jnp.tanh(gates[:, 2 * H:3 * H])
        o_g = jax.nn.sigmoid(gates[:, 3 * H:4 * H])
        c_new = f_g * c + i_g * g_g
        h_new = o_g * jnp.tanh(c_new)
        return (h_new, c_new), h_new

    init = (jnp.zeros((B, H), jnp.float32), jnp.zeros((B, H), jnp.float32))
    _, y_tm = jax.lax.scan(step, init, jnp.transpose(x, (1, 0, 2)))
    y = jnp.transpose(y_tm, (1, 0, 2))[:, :-1, :]
    return y @ params["w_fc"] + params["b_fc"][0]


# ---------------------------------- main -------------------------------------
if __name__ == "__main__":
    # small shapes implied by the module
    B, T = 2, 8
    embed_size, hidden_size, vocab_size = 32, 32, 64
    E, H, V = embed_size, hidden_size, vocab_size

    key = jax.random.PRNGKey(0)
    k = jax.random.split(key, 8)
    scale = 0.1
    params = {
        "embed":  scale * jax.random.normal(k[0], (V, E), jnp.float32),
        "w_ih":   scale * jax.random.normal(k[1], (E, 4 * H), jnp.float32),
        "w_hh":   scale * jax.random.normal(k[2], (H, 4 * H), jnp.float32),
        # b_ih + b_hh folded into one bias, kept 2D (1, 4H) for TPU layout
        "b_lstm": scale * jax.random.normal(k[3], (1, 4 * H), jnp.float32),
        "w_fc":   scale * jax.random.normal(k[4], (H, V), jnp.float32),
        "b_fc":   scale * jax.random.normal(k[5], (1, V), jnp.float32),
    }
    kparams = pad_params(params, E, H, V)   # one-time lane padding + bf16 cast

    features = jax.random.normal(k[6], (B, E), jnp.float32)
    captions = jax.random.randint(k[7], (B, T), 0, V, jnp.int32)

    fwd = jax.jit(functools.partial(decoder_forward, vocab_size=V))
    out = fwd(kparams, features, captions)
    out = jax.block_until_ready(out)

    ref = decoder_reference(params, features, captions)
    assert out.shape == (B, T, V), out.shape
    assert jnp.all(jnp.isfinite(out))
    assert jnp.allclose(out, ref, atol=1e-2, rtol=1e-2), \
        float(jnp.max(jnp.abs(out - ref)))

    print("KERNEL_OK")
</pallas_src>

<mosaic_0001>
module attributes {stable_mosaic.version = 11 : i64} {
  func.func @kernel(%arg0: i32, %arg1: memref<64x128xbf16, #tpu.memory_space<vmem>>, %arg2: memref<128x512xbf16, #tpu.memory_space<vmem>>, %arg3: memref<128x512xbf16, #tpu.memory_space<vmem>>, %arg4: memref<1x512xf32, #tpu.memory_space<vmem>>, %arg5: memref<128x128xbf16, #tpu.memory_space<vmem>>, %arg6: memref<1x128xf32, #tpu.memory_space<vmem>>, %arg7: memref<64x128xf32, #tpu.memory_space<vmem>>) attributes {dimension_semantics = [#tpu.dimension_semantics<arbitrary>], iteration_bounds = array<i64: 1>, scalar_prefetch = 0 : i64, scratch_operands = 0 : i64, tpu.core_type = #tpu.core_type<tc>, window_params = [{pipeline_mode = #tpu.pipeline_mode<synchronous>, transform_indices = @transform_0, window_bounds = array<i64: 64, 128>}, {pipeline_mode = #tpu.pipeline_mode<synchronous>, transform_indices = @transform_1, window_bounds = array<i64: 128, 512>}, {pipeline_mode = #tpu.pipeline_mode<synchronous>, transform_indices = @transform_2, window_bounds = array<i64: 128, 512>}, {pipeline_mode = #tpu.pipeline_mode<synchronous>, transform_indices = @transform_3, window_bounds = array<i64: 1, 512>}, {pipeline_mode = #tpu.pipeline_mode<synchronous>, transform_indices = @transform_4, window_bounds = array<i64: 128, 128>}, {pipeline_mode = #tpu.pipeline_mode<synchronous>, transform_indices = @transform_5, window_bounds = array<i64: 1, 128>}, {pipeline_mode = #tpu.pipeline_mode<synchronous>, transform_indices = @transform_6, window_bounds = array<i64: 64, 128>}]} {
    %c0 = arith.constant 0 : index
    %c0_0 = arith.constant 0 : index
    %0 = vector.load %arg1[%c0, %c0_0] : memref<64x128xbf16, #tpu.memory_space<vmem>>, vector<64x128xbf16>
    %c0_1 = arith.constant 0 : index
    %c0_2 = arith.constant 0 : index
    %1 = vector.load %arg2[%c0_1, %c0_2] : memref<128x512xbf16, #tpu.memory_space<vmem>>, vector<128x512xbf16>
    %cst = arith.constant dense<0.000000e+00> : vector<64x512xf32>
    %2 = tpu.matmul %0, %1, %cst {dimension_numbers = #tpu.dot_dimension_numbers<[1], [0], [0], [1], [0, 0, 1, 1], [], []>} : vector<64x128xbf16>, vector<128x512xbf16>, vector<64x512xf32> -> vector<64x512xf32>
    %c0_3 = arith.constant 0 : index
    %c0_4 = arith.constant 0 : index
    %3 = vector.load %arg4[%c0_3, %c0_4] : memref<1x512xf32, #tpu.memory_space<vmem>>, vector<1x512xf32>
    %4 = vector.broadcast %3 : vector<1x512xf32> to vector<64x512xf32>
    %5 = arith.addf %2, %4 : vector<64x512xf32>
    %c0_5 = arith.constant 0 : index
    %c0_6 = arith.constant 0 : index
    %6 = vector.load %arg3[%c0_5, %c0_6] : memref<128x512xbf16, #tpu.memory_space<vmem>>, vector<128x512xbf16>
    %cst_7 = arith.constant 0.000000e+00 : f32
    %7 = vector.broadcast %cst_7 : f32 to vector<8x128xf32>
    %cst_8 = arith.constant 0.000000e+00 : f32
    %8 = vector.broadcast %cst_8 : f32 to vector<8x128xf32>
    %9 = vector.extract_strided_slice %5 {offsets = [0, 0], sizes = [8, 512], strides = [1, 1]} : vector<64x512xf32> to vector<8x512xf32>
    %10 = arith.truncf %7 : vector<8x128xf32> to vector<8x128xbf16>
    %cst_9 = arith.constant dense<0.000000e+00> : vector<8x512xf32>
    %11 = tpu.matmul %10, %6, %cst_9 {dimension_numbers = #tpu.dot_dimension_numbers<[1], [0], [0], [1], [0, 0, 1, 1], [], []>} : vector<8x128xbf16>, vector<128x512xbf16>, vector<8x512xf32> -> vector<8x512xf32>
    %12 = arith.addf %9, %11 : vector<8x512xf32>
    %13 = vector.extract_strided_slice %12 {offsets = [0, 0], sizes = [8, 128], strides = [1, 1]} : vector<8x512xf32> to vector<8x128xf32>
    %14 = arith.negf %13 : vector<8x128xf32>
    %15 = math.exp %14 : vector<8x128xf32>
    %cst_10 = arith.constant 1.000000e+00 : f32
    %16 = vector.broadcast %cst_10 : f32 to vector<8x128xf32>
    %17 = arith.addf %16, %15 : vector<8x128xf32>
    %18 = arith.divf %16, %17 : vector<8x128xf32>
    %19 = vector.extract_strided_slice %12 {offsets = [0, 128], sizes = [8, 128], strides = [1, 1]} : vector<8x512xf32> to vector<8x128xf32>
    %20 = arith.negf %19 : vector<8x128xf32>
    %21 = math.exp %20 : vector<8x128xf32>
    %cst_11 = arith.constant 1.000000e+00 : f32
    %22 = vector.broadcast %cst_11 : f32 to vector<8x128xf32>
    %23 = arith.addf %22, %21 : vector<8x128xf32>
    %24 = arith.divf %22, %23 : vector<8x128xf32>
    %25 = vector.extract_strided_slice %12 {offsets = [0, 256], sizes = [8, 128], strides = [1, 1]} : vector<8x512xf32> to vector<8x128xf32>
    %26 = math.tanh %25 : vector<8x128xf32>
    %27 = vector.extract_strided_slice %12 {offsets = [0, 384], sizes = [8, 128], strides = [1, 1]} : vector<8x512xf32> to vector<8x128xf32>
    %28 = arith.negf %27 : vector<8x128xf32>
    %29 = math.exp %28 : vector<8x128xf32>
    %cst_12 = arith.constant 1.000000e+00 : f32
    %30 = vector.broadcast %cst_12 : f32 to vector<8x128xf32>
    %31 = arith.addf %30, %29 : vector<8x128xf32>
    %32 = arith.divf %30, %31 : vector<8x128xf32>
    %33 = arith.mulf %24, %8 : vector<8x128xf32>
    %34 = arith.mulf %18, %26 : vector<8x128xf32>
    %35 = arith.addf %33, %34 : vector<8x128xf32>
    %36 = math.tanh %35 : vector<8x128xf32>
    %37 = arith.mulf %32, %36 : vector<8x128xf32>
    %38 = vector.extract_strided_slice %5 {offsets = [8, 0], sizes = [8, 512], strides = [1, 1]} : vector<64x512xf32> to vector<8x512xf32>
    %39 = arith.truncf %37 : vector<8x128xf32> to vector<8x128xbf16>
    %cst_13 = arith.constant dense<0.000000e+00> : vector<8x512xf32>
    %40 = tpu.matmul %39, %6, %cst_13 {dimension_numbers = #tpu.dot_dimension_numbers<[1], [0], [0], [1], [0, 0, 1, 1], [], []>} : vector<8x128xbf16>, vector<128x512xbf16>, vector<8x512xf32> -> vector<8x512xf32>
    %41 = arith.addf %38, %40 : vector<8x512xf32>
    %42 = vector.extract_strided_slice %41 {offsets = [0, 0], sizes = [8, 128], strides = [1, 1]} : vector<8x512xf32> to vector<8x128xf32>
    %43 = arith.negf %42 : vector<8x128xf32>
    %44 = math.exp %43 : vector<8x128xf32>
    %cst_14 = arith.constant 1.000000e+00 : f32
    %45 = vector.broadcast %cst_14 : f32 to vector<8x128xf32>
    %46 = arith.addf %45, %44 : vector<8x128xf32>
    %47 = arith.divf %45, %46 : vector<8x128xf32>
    %48 = vector.extract_strided_slice %41 {offsets = [0, 128], sizes = [8, 128], strides = [1, 1]} : vector<8x512xf32> to vector<8x128xf32>
    %49 = arith.negf %48 : vector<8x128xf32>
    %50 = math.exp %49 : vector<8x128xf32>
    %cst_15 = arith.constant 1.000000e+00 : f32
    %51 = vector.broadcast %cst_15 : f32 to vector<8x128xf32>
    %52 = arith.addf %51, %50 : vector<8x128xf32>
    %53 = arith.divf %51, %52 : vector<8x128xf32>
    %54 = vector.extract_strided_slice %41 {offsets = [0, 256], sizes = [8, 128], strides = [1, 1]} : vector<8x512xf32> to vector<8x128xf32>
    %55 = math.tanh %54 : vector<8x128xf32>
    %56 = vector.extract_strided_slice %41 {offsets = [0, 384], sizes = [8, 128], strides = [1, 1]} : vector<8x512xf32> to vector<8x128xf32>
    %57 = arith.negf %56 : vector<8x128xf32>
    %58 = math.exp %57 : vector<8x128xf32>
    %cst_16 = arith.constant 1.000000e+00 : f32
    %59 = vector.broadcast %cst_16 : f32 to vector<8x128xf32>
    %60 = arith.addf %59, %58 : vector<8x128xf32>
    %61 = arith.divf %59, %60 : vector<8x128xf32>
    %62 = arith.mulf %53, %35 : vector<8x128xf32>
    %63 = arith.mulf %47, %55 : vector<8x128xf32>
    %64 = arith.addf %62, %63 : vector<8x128xf32>
    %65 = math.tanh %64 : vector<8x128xf32>
    %66 = arith.mulf %61, %65 : vector<8x128xf32>
    %67 = vector.extract_strided_slice %5 {offsets = [16, 0], sizes = [8, 512], strides = [1, 1]} : vector<64x512xf32> to vector<8x512xf32>
    %68 = arith.truncf %66 : vector<8x128xf32> to vector<8x128xbf16>
    %cst_17 = arith.constant dense<0.000000e+00> : vector<8x512xf32>
    %69 = tpu.matmul %68, %6, %cst_17 {dimension_numbers = #tpu.dot_dimension_numbers<[1], [0], [0], [1], [0, 0, 1, 1], [], []>} : vector<8x128xbf16>, vector<128x512xbf16>, vector<8x512xf32> -> vector<8x512xf32>
    %70 = arith.addf %67, %69 : vector<8x512xf32>
    %71 = vector.extract_strided_slice %70 {offsets = [0, 0], sizes = [8, 128], strides = [1, 1]} : vector<8x512xf32> to vector<8x128xf32>
    %72 = arith.negf %71 : vector<8x128xf32>
    %73 = math.exp %72 : vector<8x128xf32>
    %cst_18 = arith.constant 1.000000e+00 : f32
    %74 = vector.broadcast %cst_18 : f32 to vector<8x128xf32>
    %75 = arith.addf %74, %73 : vector<8x128xf32>
    %76 = arith.divf %74, %75 : vector<8x128xf32>
    %77 = vector.extract_strided_slice %70 {offsets = [0, 128], sizes = [8, 128], strides = [1, 1]} : vector<8x512xf32> to vector<8x128xf32>
    %78 = arith.negf %77 : vector<8x128xf32>
    %79 = math.exp %78 : vector<8x128xf32>
    %cst_19 = arith.constant 1.000000e+00 : f32
    %80 = vector.broadcast %cst_19 : f32 to vector<8x128xf32>
    %81 = arith.addf %80, %79 : vector<8x128xf32>
    %82 = arith.divf %80, %81 : vector<8x128xf32>
    %83 = vector.extract_strided_slice %70 {offsets = [0, 256], sizes = [8, 128], strides = [1, 1]} : vector<8x512xf32> to vector<8x128xf32>
    %84 = math.tanh %83 : vector<8x128xf32>
    %85 = vector.extract_strided_slice %70 {offsets = [0, 384], sizes = [8, 128], strides = [1, 1]} : vector<8x512xf32> to vector<8x128xf32>
    %86 = arith.negf %85 : vector<8x128xf32>
    %87 = math.exp %86 : vector<8x128xf32>
    %cst_20 = arith.constant 1.000000e+00 : f32
    %88 = vector.broadcast %cst_20 : f32 to vector<8x128xf32>
    %89 = arith.addf %88, %87 : vector<8x128xf32>
    %90 = arith.divf %88, %89 : vector<8x128xf32>
    %91 = arith.mulf %82, %64 : vector<8x128xf32>
    %92 = arith.mulf %76, %84 : vector<8x128xf32>
    %93 = arith.addf %91, %92 : vector<8x128xf32>
    %94 = math.tanh %93 : vector<8x128xf32>
    %95 = arith.mulf %90, %94 : vector<8x128xf32>
    %96 = vector.extract_strided_slice %5 {offsets = [24, 0], sizes = [8, 512], strides = [1, 1]} : vector<64x512xf32> to vector<8x512xf32>
    %97 = arith.truncf %95 : vector<8x128xf32> to vector<8x128xbf16>
    %cst_21 = arith.constant dense<0.000000e+00> : vector<8x512xf32>
    %98 = tpu.matmul %97, %6, %cst_21 {dimension_numbers = #tpu.dot_dimension_numbers<[1], [0], [0], [1], [0, 0, 1, 1], [], []>} : vector<8x128xbf16>, vector<128x512xbf16>, vector<8x512xf32> -> vector<8x512xf32>
    %99 = arith.addf %96, %98 : vector<8x512xf32>
    %100 = vector.extract_strided_slice %99 {offsets = [0, 0], sizes = [8, 128], strides = [1, 1]} : vector<8x512xf32> to vector<8x128xf32>
    %101 = arith.negf %100 : vector<8x128xf32>
    %102 = math.exp %101 : vector<8x128xf32>
    %cst_22 = arith.constant 1.000000e+00 : f32
    %103 = vector.broadcast %cst_22 : f32 to vector<8x128xf32>
    %104 = arith.addf %103, %102 : vector<8x128xf32>
    %105 = arith.divf %103, %104 : vector<8x128xf32>
    %106 = vector.extract_strided_slice %99 {offsets = [0, 128], sizes = [8, 128], strides = [1, 1]} : vector<8x512xf32> to vector<8x128xf32>
    %107 = arith.negf %106 : vector<8x128xf32>
    %108 = math.exp %107 : vector<8x128xf32>
    %cst_23 = arith.constant 1.000000e+00 : f32
    %109 = vector.broadcast %cst_23 : f32 to vector<8x128xf32>
    %110 = arith.addf %109, %108 : vector<8x128xf32>
    %111 = arith.divf %109, %110 : vector<8x128xf32>
    %112 = vector.extract_strided_slice %99 {offsets = [0, 256], sizes = [8, 128], strides = [1, 1]} : vector<8x512xf32> to vector<8x128xf32>
    %113 = math.tanh %112 : vector<8x128xf32>
    %114 = vector.extract_strided_slice %99 {offsets = [0, 384], sizes = [8, 128], strides = [1, 1]} : vector<8x512xf32> to vector<8x128xf32>
    %115 = arith.negf %114 : vector<8x128xf32>
    %116 = math.exp %115 : vector<8x128xf32>
    %cst_24 = arith.constant 1.000000e+00 : f32
    %117 = vector.broadcast %cst_24 : f32 to vector<8x128xf32>
    %118 = arith.addf %117, %116 : vector<8x128xf32>
    %119 = arith.divf %117, %118 : vector<8x128xf32>
    %120 = arith.mulf %111, %93 : vector<8x128xf32>
    %121 = arith.mulf %105, %113 : vector<8x128xf32>
    %122 = arith.addf %120, %121 : vector<8x128xf32>
    %123 = math.tanh %122 : vector<8x128xf32>
    %124 = arith.mulf %119, %123 : vector<8x128xf32>
    %125 = vector.extract_strided_slice %5 {offsets = [32, 0], sizes = [8, 512], strides = [1, 1]} : vector<64x512xf32> to vector<8x512xf32>
    %126 = arith.truncf %124 : vector<8x128xf32> to vector<8x128xbf16>
    %cst_25 = arith.constant dense<0.000000e+00> : vector<8x512xf32>
    %127 = tpu.matmul %126, %6, %cst_25 {dimension_numbers = #tpu.dot_dimension_numbers<[1], [0], [0], [1], [0, 0, 1, 1], [], []>} : vector<8x128xbf16>, vector<128x512xbf16>, vector<8x512xf32> -> vector<8x512xf32>
    %128 = arith.addf %125, %127 : vector<8x512xf32>
    %129 = vector.extract_strided_slice %128 {offsets = [0, 0], sizes = [8, 128], strides = [1, 1]} : vector<8x512xf32> to vector<8x128xf32>
    %130 = arith.negf %129 : vector<8x128xf32>
    %131 = math.exp %130 : vector<8x128xf32>
    %cst_26 = arith.constant 1.000000e+00 : f32
    %132 = vector.broadcast %cst_26 : f32 to vector<8x128xf32>
    %133 = arith.addf %132, %131 : vector<8x128xf32>
    %134 = arith.divf %132, %133 : vector<8x128xf32>
    %135 = vector.extract_strided_slice %128 {offsets = [0, 128], sizes = [8, 128], strides = [1, 1]} : vector<8x512xf32> to vector<8x128xf32>
    %136 = arith.negf %135 : vector<8x128xf32>
    %137 = math.exp %136 : vector<8x128xf32>
    %cst_27 = arith.constant 1.000000e+00 : f32
    %138 = vector.broadcast %cst_27 : f32 to vector<8x128xf32>
    %139 = arith.addf %138, %137 : vector<8x128xf32>
    %140 = arith.divf %138, %139 : vector<8x128xf32>
    %141 = vector.extract_strided_slice %128 {offsets = [0, 256], sizes = [8, 128], strides = [1, 1]} : vector<8x512xf32> to vector<8x128xf32>
    %142 = math.tanh %141 : vector<8x128xf32>
    %143 = vector.extract_strided_slice %128 {offsets = [0, 384], sizes = [8, 128], strides = [1, 1]} : vector<8x512xf32> to vector<8x128xf32>
    %144 = arith.negf %143 : vector<8x128xf32>
    %145 = math.exp %144 : vector<8x128xf32>
    %cst_28 = arith.constant 1.000000e+00 : f32
    %146 = vector.broadcast %cst_28 : f32 to vector<8x128xf32>
    %147 = arith.addf %146, %145 : vector<8x128xf32>
    %148 = arith.divf %146, %147 : vector<8x128xf32>
    %149 = arith.mulf %140, %122 : vector<8x128xf32>
    %150 = arith.mulf %134, %142 : vector<8x128xf32>
    %151 = arith.addf %149, %150 : vector<8x128xf32>
    %152 = math.tanh %151 : vector<8x128xf32>
    %153 = arith.mulf %148, %152 : vector<8x128xf32>
    %154 = vector.extract_strided_slice %5 {offsets = [40, 0], sizes = [8, 512], strides = [1, 1]} : vector<64x512xf32> to vector<8x512xf32>
    %155 = arith.truncf %153 : vector<8x128xf32> to vector<8x128xbf16>
    %cst_29 = arith.constant dense<0.000000e+00> : vector<8x512xf32>
    %156 = tpu.matmul %155, %6, %cst_29 {dimension_numbers = #tpu.dot_dimension_numbers<[1], [0], [0], [1], [0, 0, 1, 1], [], []>} : vector<8x128xbf16>, vector<128x512xbf16>, vector<8x512xf32> -> vector<8x512xf32>
    %157 = arith.addf %154, %156 : vector<8x512xf32>
    %158 = vector.extract_strided_slice %157 {offsets = [0, 0], sizes = [8, 128], strides = [1, 1]} : vector<8x512xf32> to vector<8x128xf32>
    %159 = arith.negf %158 : vector<8x128xf32>
    %160 = math.exp %159 : vector<8x128xf32>
    %cst_30 = arith.constant 1.000000e+00 : f32
    %161 = vector.broadcast %cst_30 : f32 to vector<8x128xf32>
    %162 = arith.addf %161, %160 : vector<8x128xf32>
    %163 = arith.divf %161, %162 : vector<8x128xf32>
    %164 = vector.extract_strided_slice %157 {offsets = [0, 128], sizes = [8, 128], strides = [1, 1]} : vector<8x512xf32> to vector<8x128xf32>
    %165 = arith.negf %164 : vector<8x128xf32>
    %166 = math.exp %165 : vector<8x128xf32>
    %cst_31 = arith.constant 1.000000e+00 : f32
    %167 = vector.broadcast %cst_31 : f32 to vector<8x128xf32>
    %168 = arith.addf %167, %166 : vector<8x128xf32>
    %169 = arith.divf %167, %168 : vector<8x128xf32>
    %170 = vector.extract_strided_slice %157 {offsets = [0, 256], sizes = [8, 128], strides = [1, 1]} : vector<8x512xf32> to vector<8x128xf32>
    %171 = math.tanh %170 : vector<8x128xf32>
    %172 = vector.extract_strided_slice %157 {offsets = [0, 384], sizes = [8, 128], strides = [1, 1]} : vector<8x512xf32> to vector<8x128xf32>
    %173 = arith.negf %172 : vector<8x128xf32>
    %174 = math.exp %173 : vector<8x128xf32>
    %cst_32 = arith.constant 1.000000e+00 : f32
    %175 = vector.broadcast %cst_32 : f32 to vector<8x128xf32>
    %176 = arith.addf %175, %174 : vector<8x128xf32>
    %177 = arith.divf %175, %176 : vector<8x128xf32>
    %178 = arith.mulf %169, %151 : vector<8x128xf32>
    %179 = arith.mulf %163, %171 : vector<8x128xf32>
    %180 = arith.addf %178, %179 : vector<8x128xf32>
    %181 = math.tanh %180 : vector<8x128xf32>
    %182 = arith.mulf %177, %181 : vector<8x128xf32>
    %183 = vector.extract_strided_slice %5 {offsets = [48, 0], sizes = [8, 512], strides = [1, 1]} : vector<64x512xf32> to vector<8x512xf32>
    %184 = arith.truncf %182 : vector<8x128xf32> to vector<8x128xbf16>
    %cst_33 = arith.constant dense<0.000000e+00> : vector<8x512xf32>
    %185 = tpu.matmul %184, %6, %cst_33 {dimension_numbers = #tpu.dot_dimension_numbers<[1], [0], [0], [1], [0, 0, 1, 1], [], []>} : vector<8x128xbf16>, vector<128x512xbf16>, vector<8x512xf32> -> vector<8x512xf32>
    %186 = arith.addf %183, %185 : vector<8x512xf32>
    %187 = vector.extract_strided_slice %186 {offsets = [0, 0], sizes = [8, 128], strides = [1, 1]} : vector<8x512xf32> to vector<8x128xf32>
    %188 = arith.negf %187 : vector<8x128xf32>
    %189 = math.exp %188 : vector<8x128xf32>
    %cst_34 = arith.constant 1.000000e+00 : f32
    %190 = vector.broadcast %cst_34 : f32 to vector<8x128xf32>
    %191 = arith.addf %190, %189 : vector<8x128xf32>
    %192 = arith.divf %190, %191 : vector<8x128xf32>
    %193 = vector.extract_strided_slice %186 {offsets = [0, 128], sizes = [8, 128], strides = [1, 1]} : vector<8x512xf32> to vector<8x128xf32>
    %194 = arith.negf %193 : vector<8x128xf32>
    %195 = math.exp %194 : vector<8x128xf32>
    %cst_35 = arith.constant 1.000000e+00 : f32
    %196 = vector.broadcast %cst_35 : f32 to vector<8x128xf32>
    %197 = arith.addf %196, %195 : vector<8x128xf32>
    %198 = arith.divf %196, %197 : vector<8x128xf32>
    %199 = vector.extract_strided_slice %186 {offsets = [0, 256], sizes = [8, 128], strides = [1, 1]} : vector<8x512xf32> to vector<8x128xf32>
    %200 = math.tanh %199 : vector<8x128xf32>
    %201 = vector.extract_strided_slice %186 {offsets = [0, 384], sizes = [8, 128], strides = [1, 1]} : vector<8x512xf32> to vector<8x128xf32>
    %202 = arith.negf %201 : vector<8x128xf32>
    %203 = math.exp %202 : vector<8x128xf32>
    %cst_36 = arith.constant 1.000000e+00 : f32
    %204 = vector.broadcast %cst_36 : f32 to vector<8x128xf32>
    %205 = arith.addf %204, %203 : vector<8x128xf32>
    %206 = arith.divf %204, %205 : vector<8x128xf32>
    %207 = arith.mulf %198, %180 : vector<8x128xf32>
    %208 = arith.mulf %192, %200 : vector<8x128xf32>
    %209 = arith.addf %207, %208 : vector<8x128xf32>
    %210 = math.tanh %209 : vector<8x128xf32>
    %211 = arith.mulf %206, %210 : vector<8x128xf32>
    %212 = vector.extract_strided_slice %5 {offsets = [56, 0], sizes = [8, 512], strides = [1, 1]} : vector<64x512xf32> to vector<8x512xf32>
    %213 = arith.truncf %211 : vector<8x128xf32> to vector<8x128xbf16>
    %cst_37 = arith.constant dense<0.000000e+00> : vector<8x512xf32>
    %214 = tpu.matmul %213, %6, %cst_37 {dimension_numbers = #tpu.dot_dimension_numbers<[1], [0], [0], [1], [0, 0, 1, 1], [], []>} : vector<8x128xbf16>, vector<128x512xbf16>, vector<8x512xf32> -> vector<8x512xf32>
    %215 = arith.addf %212, %214 : vector<8x512xf32>
    %216 = vector.extract_strided_slice %215 {offsets = [0, 0], sizes = [8, 128], strides = [1, 1]} : vector<8x512xf32> to vector<8x128xf32>
    %217 = arith.negf %216 : vector<8x128xf32>
    %218 = math.exp %217 : vector<8x128xf32>
    %cst_38 = arith.constant 1.000000e+00 : f32
    %219 = vector.broadcast %cst_38 : f32 to vector<8x128xf32>
    %220 = arith.addf %219, %218 : vector<8x128xf32>
    %221 = arith.divf %219, %220 : vector<8x128xf32>
    %222 = vector.extract_strided_slice %215 {offsets = [0, 128], sizes = [8, 128], strides = [1, 1]} : vector<8x512xf32> to vector<8x128xf32>
    %223 = arith.negf %222 : vector<8x128xf32>
    %224 = math.exp %223 : vector<8x128xf32>
    %cst_39 = arith.constant 1.000000e+00 : f32
    %225 = vector.broadcast %cst_39 : f32 to vector<8x128xf32>
    %226 = arith.addf %225, %224 : vector<8x128xf32>
    %227 = arith.divf %225, %226 : vector<8x128xf32>
    %228 = vector.extract_strided_slice %215 {offsets = [0, 256], sizes = [8, 128], strides = [1, 1]} : vector<8x512xf32> to vector<8x128xf32>
    %229 = math.tanh %228 : vector<8x128xf32>
    %230 = vector.extract_strided_slice %215 {offsets = [0, 384], sizes = [8, 128], strides = [1, 1]} : vector<8x512xf32> to vector<8x128xf32>
    %231 = arith.negf %230 : vector<8x128xf32>
    %232 = math.exp %231 : vector<8x128xf32>
    %cst_40 = arith.constant 1.000000e+00 : f32
    %233 = vector.broadcast %cst_40 : f32 to vector<8x128xf32>
    %234 = arith.addf %233, %232 : vector<8x128xf32>
    %235 = arith.divf %233, %234 : vector<8x128xf32>
    %236 = arith.mulf %227, %209 : vector<8x128xf32>
    %237 = arith.mulf %221, %229 : vector<8x128xf32>
    %238 = arith.addf %236, %237 : vector<8x128xf32>
    %239 = math.tanh %238 : vector<8x128xf32>
    %240 = arith.mulf %235, %239 : vector<8x128xf32>
    %241 = tpu.concatenate %37, %66, %95, %124, %153, %182, %211, %240 in 0 : vector<8x128xf32>, vector<8x128xf32>, vector<8x128xf32>, vector<8x128xf32>, vector<8x128xf32>, vector<8x128xf32>, vector<8x128xf32>, vector<8x128xf32> -> vector<64x128xf32>
    %242 = arith.truncf %241 : vector<64x128xf32> to vector<64x128xbf16>
    %c0_41 = arith.constant 0 : index
    %c0_42 = arith.constant 0 : index
    %243 = vector.load %arg5[%c0_41, %c0_42] : memref<128x128xbf16, #tpu.memory_space<vmem>>, vector<128x128xbf16>
    %cst_43 = arith.constant dense<0.000000e+00> : vector<64x128xf32>
    %244 = tpu.matmul %242, %243, %cst_43 {dimension_numbers = #tpu.dot_dimension_numbers<[1], [0], [0], [1], [0, 0, 1, 1], [], []>} : vector<64x128xbf16>, vector<128x128xbf16>, vector<64x128xf32> -> vector<64x128xf32>
    %c0_44 = arith.constant 0 : index
    %c0_45 = arith.constant 0 : index
    %245 = vector.load %arg6[%c0_44, %c0_45] : memref<1x128xf32, #tpu.memory_space<vmem>>, vector<1x128xf32>
    %246 = vector.broadcast %245 : vector<1x128xf32> to vector<64x128xf32>
    %247 = arith.addf %244, %246 : vector<64x128xf32>
    %c0_46 = arith.constant 0 : index
    %c0_47 = arith.constant 0 : index
    %248 = vector.load %arg7[%c0_46, %c0_47] : memref<64x128xf32, #tpu.memory_space<vmem>>, vector<64x128xf32>
    tpu.vector_store %arg7[%c0_46, %c0_47], %247 {strides = array<i32>} : memref<64x128xf32, #tpu.memory_space<vmem>>, vector<64x128xf32>,
    return
  }
  func.func @transform_0(%arg0: i32) -> (i32, i32) {
    %c0_i32 = arith.constant 0 : i32
    %c0_i32_0 = arith.constant 0 : i32
    %c0_i32_1 = arith.constant 0 : i32
    return %c0_i32, %c0_i32_0 : i32, i32
  }
  func.func @transform_1(%arg0: i32) -> (i32, i32) {
    %c0_i32 = arith.constant 0 : i32
    %c0_i32_0 = arith.constant 0 : i32
    %c0_i32_1 = arith.constant 0 : i32
    return %c0_i32, %c0_i32_0 : i32, i32
  }
  func.func @transform_2(%arg0: i32) -> (i32, i32) {
    %c0_i32 = arith.constant 0 : i32
    %c0_i32_0 = arith.constant 0 : i32
    %c0_i32_1 = arith.constant 0 : i32
    return %c0_i32, %c0_i32_0 : i32, i32
  }
  func.func @transform_3(%arg0: i32) -> (i32, i32) {
    %c0_i32 = arith.constant 0 : i32
    %c0_i32_0 = arith.constant 0 : i32
    %c0_i32_1 = arith.constant 0 : i32
    return %c0_i32, %c0_i32_0 : i32, i32
  }
  func.func @transform_4(%arg0: i32) -> (i32, i32) {
    %c0_i32 = arith.constant 0 : i32
    %c0_i32_0 = arith.constant 0 : i32
    %c0_i32_1 = arith.constant 0 : i32
    return %c0_i32, %c0_i32_0 : i32, i32
  }
  func.func @transform_5(%arg0: i32) -> (i32, i32) {
    %c0_i32 = arith.constant 0 : i32
    %c0_i32_0 = arith.constant 0 : i32
    %c0_i32_1 = arith.constant 0 : i32
    return %c0_i32, %c0_i32_0 : i32, i32
  }
  func.func @transform_6(%arg0: i32) -> (i32, i32) {
    %c0_i32 = arith.constant 0 : i32
    %c0_i32_0 = arith.constant 0 : i32
    %c0_i32_1 = arith.constant 0 : i32
    return %c0_i32, %c0_i32_0 : i32, i32
  }
}

</mosaic_0001>

<bundles_post_ra>
// kernel: decoder_forward.1
= control target key start
LH: loop header
LB: loop body
LE: loop exit
PB: predicated region body
PF: predicated region fallthrough
CT: control target
= control target key end

     0   :  { %11 = vsyncpa [#allocation3], 0  ;;  %s2854_s0 = inlined_call_operand.vmem [shape: bf16[64,128], index: 0, kind: input, shape index: {}]   ;;  %s2855_s1 = inlined_call_operand.vmem [shape: bf16[128,512], index: 1, kind: input, shape index: {}]   ;;  %s2856_s2 = inlined_call_operand.hbm [shape: bf16[128,512], index: 2, kind: input, shape index: {}]   ;;  %s2857_s3 = inlined_call_operand.vmem [shape: f32[1,512], index: 3, kind: input, shape index: {}]   ;;  %s2858_s4 = inlined_call_operand.hbm [shape: bf16[128,128], index: 4, kind: input, shape index: {}]   ;;  %s2859_s5 = inlined_call_operand.vmem [shape: f32[1,128], index: 5, kind: input, shape index: {}]   ;;  %s2860_s6 = inlined_call_operand.vmem [shape: f32[64,128], index: 6, kind: output, shape index: {}]  }
   0x1   :  { %12 = vsyncpa [#allocation5], 0  ;;  %s2137_s21 = smov [#allocation2]   ;;  %s2089_s25 = scalar_lea.hbm %s2856_s2, 4096 }
   0x2   :  { %s22_s22 = sshll.u32 %s2137_s21, 4  ;;  %p2090_p0 = scmp.ne.s32.totalorder %s2856_s2, %s2089_s25  ;;  %s23_s22 = int_to_ptr.vmem [resolvable:$true] %s22_s22 }
   0x3   :  { %p2093_p1 = scmp.lt.u32.totalorder %s2089_s25, %s2856_s2 }
   0x5   :  { %p2095_p2 = pnand %p2093_p1, %p2090_p0 }
   0x7   :  { %2098 = shalt.err (!%p2095_p2)
}
   0x8   :  { %s2099_s30 = scalar_lea.vmem %s23_s22, 4096  ;;  %p2104_p4 = scmp.lt.s32.totalorder %s23_s22, %s23_s22 }
   0x9   :  { %p2100_p3 = scmp.ne.s32.totalorder %s23_s22, %s2099_s30  ;;  %p2105_p5 = scmp.lt.s32.totalorder %s2099_s30, %s2099_s30 }
   0xb   :  { %p2106_p6 = por %p2105_p5, %p2104_p4 }
   0xd   :  { %p2107_p7 = pnand %p2106_p6, %p2100_p3 }
   0xf   :  { %2110 = shalt.err (!%p2107_p7)
}
  0x10   :  { %s2138_s7 = smov 256   ;;  %s2139_s8 = smov 16  }
  0x11   :  { %28 = dma.hbm_to_vmem [thread:$0]  %s2856_s2, 4096, %s23_s22, [#allocation3], %s2138_s7, %s2138_s7, %s2139_s8  }
  0x12   :  { %s2140_s11 = smov [#allocation4]   ;;  %s2111_s15 = scalar_lea.hbm %s2858_s4, 1024 }
  0x13   :  { %s36_s12 = sshll.u32 %s2140_s11, 4  ;;  %p2112_p8 = scmp.ne.s32.totalorder %s2858_s4, %s2111_s15  ;;  %s37_s12 = int_to_ptr.vmem [resolvable:$true] %s36_s12 }
  0x14   :  { %p2115_p9 = scmp.lt.u32.totalorder %s2111_s15, %s2858_s4 }
  0x16   :  { %p2117_p10 = pnand %p2115_p9, %p2112_p8 }
  0x18   :  { %2120 = shalt.err (!%p2117_p10)
}
  0x19   :  { %s2121_s20 = scalar_lea.vmem %s37_s12, 1024  ;;  %p2126_p12 = scmp.lt.s32.totalorder %s37_s12, %s37_s12 }
  0x1a   :  { %p2122_p11 = scmp.ne.s32.totalorder %s37_s12, %s2121_s20  ;;  %p2127_p13 = scmp.lt.s32.totalorder %s2121_s20, %s2121_s20 }
  0x1c   :  { %p2128_p0 = por %p2127_p13, %p2126_p12 }
  0x1e   :  { %p2129_p1 = pnand %p2128_p0, %p2122_p11 }
  0x20   :  { %2132 = shalt.err (!%p2129_p1)
}
  0x21   :  { %s2141_s2 = smov 64   ;;  %s2142_s21 = smov 4  }
  0x22   :  { %42 = dma.hbm_to_vmem [thread:$0]  %s2858_s4, 1024, %s37_s12, [#allocation5], %s2141_s2, %s2141_s2, %s2142_s21  }
  0x23   :  { %2133 = dma.done.wait [#allocation3], 4096  }
  0x24   :  { %2134 = vsyncadd [#allocation3], 4294963200 }
  0x25   :  { %2135 = dma.done.wait [#allocation5], 1024  }
  0x26   :  { %2136 = vsyncadd [#allocation5], 4294966272  ;;  %v2861_v0 = vmov 0   ;;  %v1821_v1 = vld [vmem:[%s2855_s1 + $0x4] ss:$16 sps:$4 sm:$0xff]   ;;  %v1876_v39 = vld [vmem:[%s2854_s0 + $0x8] sm:$0xff]  }
  0x27   :  { %330 = vmatprep.mubr.bf16.mxu1 %v2861_v0  ;;  %668 = vmatprep.mubr.bf16.mxu0 %v2861_v0  ;;  %v1823_v2 = vld [vmem:[%s2855_s1] ss:$16 sps:$4 sm:$0xff]   ;;  %v2211_v3 = vld [vmem:[#allocation2 + $0x4] ss:$16 sps:$4 sm:$0xff]   ;;  %v1872_v32 = vld [vmem:[%s2855_s1 + $0xc] ss:$16 sps:$4 sm:$0xff]  }
  0x28   :  { %298 = vmatprep.subr.bf16.mxu1 %v1821_v1  ;;  %v2213_v4 = vld [vmem:[#allocation2] ss:$16 sps:$4 sm:$0xff]   ;;  %v1827_v5 = vld [vmem:[%s2855_s1 + $0x24] ss:$16 sps:$4 sm:$0xff]   ;;  %636 = vmatprep.subr.bf16.mxu0 %v2211_v3  ;;  %v1870_v35 = vld [vmem:[%s2855_s1 + $0x8] ss:$16 sps:$4 sm:$0xff]  }
  0x29   :  { %299 = vmatpush1.bf16.msra.mxu1 %v1823_v2  ;;  %v1829_v6 = vld [vmem:[%s2855_s1 + $0x20] ss:$16 sps:$4 sm:$0xff]   ;;  %v2222_v7 = vld [vmem:[#allocation2 + $0x24] ss:$16 sps:$4 sm:$0xff]   ;;  %637 = vmatpush1.bf16.msra.mxu0 %v2213_v4  ;;  %v1875_v36 = vld [vmem:[%s2855_s1 + $0x2c] ss:$16 sps:$4 sm:$0xff]  }
  0x2a   :  { %300 = vmatprep.subr.bf16.mxu1 %v1827_v5  ;;  %v2225_v8 = vld [vmem:[#allocation2 + $0x20] ss:$16 sps:$4 sm:$0xff]   ;;  %638 = vmatprep.subr.bf16.mxu0 %v2222_v7  ;;  %v1833_v9 = vld [vmem:[%s2855_s1 + $0x44] ss:$16 sps:$4 sm:$0xff]   ;;  %v1873_v37 = vld [vmem:[%s2855_s1 + $0x28] ss:$16 sps:$4 sm:$0xff]  }
  0x2b   :  { %v1835_v10 = vld [vmem:[%s2855_s1 + $0x40] ss:$16 sps:$4 sm:$0xff]   ;;  %v2234_v11 = vld [vmem:[#allocation2 + $0x44] ss:$16 sps:$4 sm:$0xff]   ;;  %v1879_v38 = vld [vmem:[%s2855_s1 + $0x4c] ss:$16 sps:$4 sm:$0xff]  }
  0x2c   :  { %v1839_v12 = vld [vmem:[%s2855_s1 + $0x64] ss:$16 sps:$4 sm:$0xff]   ;;  %v2240_v13 = vld [vmem:[#allocation2 + $0x40] ss:$16 sps:$4 sm:$0xff]   ;;  %v1877_v40 = vld [vmem:[%s2855_s1 + $0x48] ss:$16 sps:$4 sm:$0xff]  }
  0x2d   :  { %301 = vmatpush1.bf16.msra.mxu1 %v1829_v6  ;;  %639 = vmatpush1.bf16.msra.mxu0 %v2225_v8  ;;  %v2243_v14 = vld [vmem:[#allocation2 + $0x64] ss:$16 sps:$4 sm:$0xff]   ;;  %v1841_v15 = vld [vmem:[%s2855_s1 + $0x60] ss:$16 sps:$4 sm:$0xff]   ;;  %v1882_v41 = vld [vmem:[%s2855_s1 + $0x6c] ss:$16 sps:$4 sm:$0xff]  }
  0x2e   :  { %302 = vmatprep.subr.bf16.mxu1 %v1833_v9  ;;  %640 = vmatprep.subr.bf16.mxu0 %v2234_v11  ;;  %v1845_v16 = vld [vmem:[%s2855_s1 + $0x84] ss:$16 sps:$4 sm:$0xff]   ;;  %v2252_v17 = vld [vmem:[#allocation2 + $0x60] ss:$16 sps:$4 sm:$0xff]   ;;  %v1880_v42 = vld [vmem:[%s2855_s1 + $0x68] ss:$16 sps:$4 sm:$0xff]  }
  0x2f   :  { %v2255_v18 = vld [vmem:[#allocation2 + $0x84] ss:$16 sps:$4 sm:$0xff]   ;;  %v1847_v19 = vld [vmem:[%s2855_s1 + $0x80] ss:$16 sps:$4 sm:$0xff]   ;;  %v1886_v43 = vld [vmem:[%s2855_s1 + $0x8c] ss:$16 sps:$4 sm:$0xff]  }
  0x30   :  { %v1851_v20 = vld [vmem:[%s2855_s1 + $0xa4] ss:$16 sps:$4 sm:$0xff]   ;;  %v2264_v21 = vld [vmem:[#allocation2 + $0x80] ss:$16 sps:$4 sm:$0xff]   ;;  %v1884_v45 = vld [vmem:[%s2855_s1 + $0x88] ss:$16 sps:$4 sm:$0xff]  }
  0x31   :  { %303 = vmatpush1.bf16.msra.mxu1 %v1835_v10  ;;  %641 = vmatpush1.bf16.msra.mxu0 %v2240_v13  ;;  %v2267_v22 = vld [vmem:[#allocation2 + $0xa4] ss:$16 sps:$4 sm:$0xff]   ;;  %v1853_v23 = vld [vmem:[%s2855_s1 + $0xa0] ss:$16 sps:$4 sm:$0xff]   ;;  %v1889_v46 = vld [vmem:[%s2855_s1 + $0xac] ss:$16 sps:$4 sm:$0xff]   ;;  %v94_v10 = vlaneseq }
  0x32   :  { %304 = vmatprep.subr.bf16.mxu1 %v1839_v12  ;;  %642 = vmatprep.subr.bf16.mxu0 %v2243_v14  ;;  %v1857_v24 = vld [vmem:[%s2855_s1 + $0xc4] ss:$16 sps:$4 sm:$0xff]   ;;  %v2276_v25 = vld [vmem:[#allocation2 + $0xa0] ss:$16 sps:$4 sm:$0xff]   ;;  %v1887_v47 = vld [vmem:[%s2855_s1 + $0xa8] ss:$16 sps:$4 sm:$0xff]  }
  0x33   :  { %v2279_v26 = vld [vmem:[#allocation2 + $0xc4] ss:$16 sps:$4 sm:$0xff]   ;;  %v1859_v27 = vld [vmem:[%s2855_s1 + $0xc0] ss:$16 sps:$4 sm:$0xff]   ;;  %v1893_v48 = vld [vmem:[%s2855_s1 + $0xcc] ss:$16 sps:$4 sm:$0xff]  }
  0x34   :  { %v1863_v28 = vld [vmem:[%s2855_s1 + $0xe4] ss:$16 sps:$4 sm:$0xff]   ;;  %v2288_v29 = vld [vmem:[#allocation2 + $0xc0] ss:$16 sps:$4 sm:$0xff]   ;;  %v1890_v49 = vld [vmem:[%s2854_s0 + $0x18] sm:$0xff]   ;;  %v95_v12 = vshrl.u32 %v94_v10, 7 }
  0x35   :  { %305 = vmatpush1.bf16.msra.mxu1 %v1841_v15  ;;  %643 = vmatpush1.bf16.msra.mxu0 %v2252_v17  ;;  %v2291_v30 = vld [vmem:[#allocation2 + $0xe4] ss:$16 sps:$4 sm:$0xff]   ;;  %v1865_v31 = vld [vmem:[%s2855_s1 + $0xe0] ss:$16 sps:$4 sm:$0xff]   ;;  %v1891_v50 = vld [vmem:[%s2855_s1 + $0xc8] ss:$16 sps:$4 sm:$0xff]  }
  0x36   :  { %306 = vmatprep.subr.bf16.mxu1 %v1845_v16  ;;  %644 = vmatprep.subr.bf16.mxu0 %v2255_v18  ;;  %v2300_v33 = vld [vmem:[#allocation2 + $0xe0] ss:$16 sps:$4 sm:$0xff]   ;;  %v1896_v51 = vld [vmem:[%s2855_s1 + $0xec] ss:$16 sps:$4 sm:$0xff]   ;;  %v1894_v52 = vld [vmem:[%s2855_s1 + $0xe8] ss:$16 sps:$4 sm:$0xff]  }
  0x37   :  { %v2306_v34 = vld [vmem:[%s2854_s0] sm:$0xff]   ;;  %v1883_v44 = vld [vmem:[%s2854_s0 + $0x10] sm:$0xff]   ;;  %v2383_v53 = vld [vmem:[#allocation2 + $0xc] ss:$16 sps:$4 sm:$0xff]   ;;  %v96_v15 = vsub.s32 0, %v95_v12 }
  0x38   :  { %v2387_v54 = vld [vmem:[#allocation2 + $0x8] ss:$16 sps:$4 sm:$0xff]   ;;  %v2390_v55 = vld [vmem:[#allocation2 + $0x2c] ss:$16 sps:$4 sm:$0xff]   ;;  %v92_v16 = vld [vmem:[%s2857_s3] sm:$0xf] }
  0x39   :  { %307 = vmatpush1.bf16.msra.mxu1 %v1847_v19  ;;  %645 = vmatpush1.bf16.msra.mxu0 %v2264_v21  ;;  %v2396_v56 = vld [vmem:[#allocation2 + $0x28] ss:$16 sps:$4 sm:$0xff]   ;;  %v2400_v57 = vld [vmem:[#allocation2 + $0x4c] ss:$16 sps:$4 sm:$0xff]   ;;  %v100_v19 = vsub.s32 1, %v95_v12 }
  0x3a   :  { %308 = vmatprep.subr.bf16.mxu1 %v1851_v20  ;;  %646 = vmatprep.subr.bf16.mxu0 %v2267_v22  ;;  %v2403_v58 = vld [vmem:[#allocation2 + $0x48] ss:$16 sps:$4 sm:$0xff]   ;;  %v2406_v59 = vld [vmem:[#allocation2 + $0x6c] ss:$16 sps:$4 sm:$0xff]   ;;  %v97_v20 = vrot.slane %v92_v16, %v96_v15 }
  0x3b   :  { %v2409_v60 = vld [vmem:[#allocation2 + $0x68] ss:$16 sps:$4 sm:$0xff]   ;;  %v2413_v61 = vld [vmem:[#allocation2 + $0x8c] ss:$16 sps:$4 sm:$0xff]  }
  0x3c   :  { %v2416_v62 = vld [vmem:[#allocation2 + $0x88] ss:$16 sps:$4 sm:$0xff]   ;;  %v2419_v63 = vld [vmem:[#allocation2 + $0xac] ss:$16 sps:$4 sm:$0xff]  }
  0x3d   :  { %309 = vmatpush1.bf16.msra.mxu1 %v1853_v23  ;;  %647 = vmatpush1.bf16.msra.mxu0 %v2276_v25  ;;  %v2422_v1 = vld [vmem:[#allocation2 + $0xa8] ss:$16 sps:$4 sm:$0xff]   ;;  %v2426_v2 = vld [vmem:[#allocation2 + $0xcc] ss:$16 sps:$4 sm:$0xff]   ;;  %v101_v23 = vrot.slane %v92_v16, %v100_v19 }
  0x3e   :  { %310 = vmatprep.subr.bf16.mxu1 %v1857_v24  ;;  %648 = vmatprep.subr.bf16.mxu0 %v2279_v26  ;;  %v2429_v5 = vld [vmem:[#allocation2 + $0xc8] ss:$16 sps:$4 sm:$0xff]   ;;  %v2432_v6 = vld [vmem:[#allocation2 + $0xec] ss:$16 sps:$4 sm:$0xff]  }
  0x3f   :  { %v2435_v9 = vld [vmem:[#allocation2 + $0xe8] ss:$16 sps:$4 sm:$0xff]  }
  0x41   :  { %311 = vmatpush1.bf16.msra.mxu1 %v1859_v27  ;;  %649 = vmatpush1.bf16.msra.mxu0 %v2288_v29 }
  0x42   :  { %312 = vmatprep.subr.bf16.mxu1 %v1863_v28  ;;  %650 = vmatprep.subr.bf16.mxu0 %v2291_v30 }
  0x45   :  { %313 = vmatpush1.bf16.msra.mxu1 %v1865_v31  ;;  %651 = vmatpush1.bf16.msra.mxu0 %v2300_v33 }
  0x46   :  { %371 = vmatprep.subr.bf16.mxu1 %v1872_v32  ;;  %747 = vmatprep.subr.bf16.mxu0 %v2211_v3 }
  0x48   :  { %331 = vmatmul.mubr.bf16.vlgmr.msra.gmra.mrb[0].mxu1 %v2306_v34  ;;  %669 = vmatmul.mubr.bf16.vlgmr.msra.gmra.mrb[0].mxu0 %v2861_v0 }
  0x49   :  { %372 = vmatpush1.bf16.msra.mxu1 %v1870_v35  ;;  %340 = vmatprep.mubr.bf16.mxu1 %v2861_v0 }
  0x4a   :  { %373 = vmatprep.subr.bf16.mxu1 %v1875_v36  ;;  %748 = vmatpush1.bf16.msra.mxu0 %v2213_v4 }
  0x4b   :  { %779 = vmatprep.mubr.bf16.mxu0 %v2861_v0  ;;  %749 = vmatprep.subr.bf16.mxu0 %v2222_v7 }
  0x4d   :  { %374 = vmatpush1.bf16.msra.mxu1 %v1873_v37 }
  0x4e   :  { %375 = vmatprep.subr.bf16.mxu1 %v1879_v38  ;;  %750 = vmatpush1.bf16.msra.mxu0 %v2225_v8 }
  0x4f   :  { %751 = vmatprep.subr.bf16.mxu0 %v2234_v11 }
  0x50   :  { %341 = vmatmul.mubr.bf16.gmra.mrb[4].mxu1 %v1876_v39 }
  0x51   :  { %376 = vmatpush1.bf16.msra.mxu1 %v1877_v40  ;;  %350 = vmatprep.mubr.bf16.mxu1 %v2861_v0 }
  0x52   :  { %377 = vmatprep.subr.bf16.mxu1 %v1882_v41  ;;  %752 = vmatpush1.bf16.msra.mxu0 %v2240_v13 }
  0x53   :  { %753 = vmatprep.subr.bf16.mxu0 %v2243_v14 }
  0x55   :  { %378 = vmatpush1.bf16.msra.mxu1 %v1880_v42 }
  0x56   :  { %379 = vmatprep.subr.bf16.mxu1 %v1886_v43  ;;  %754 = vmatpush1.bf16.msra.mxu0 %v2252_v17 }
  0x57   :  { %755 = vmatprep.subr.bf16.mxu0 %v2255_v18 }
  0x58   :  { %351 = vmatmul.mubr.bf16.gmra.mrb[8].mxu1 %v1883_v44 }
  0x59   :  { %380 = vmatpush1.bf16.msra.mxu1 %v1884_v45  ;;  %360 = vmatprep.mubr.bf16.mxu1 %v2861_v0 }
  0x5a   :  { %381 = vmatprep.subr.bf16.mxu1 %v1889_v46  ;;  %756 = vmatpush1.bf16.msra.mxu0 %v2264_v21 }
  0x5b   :  { %757 = vmatprep.subr.bf16.mxu0 %v2267_v22 }
  0x5d   :  { %382 = vmatpush1.bf16.msra.mxu1 %v1887_v47 }
  0x5e   :  { %383 = vmatprep.subr.bf16.mxu1 %v1893_v48  ;;  %758 = vmatpush1.bf16.msra.mxu0 %v2276_v25 }
  0x5f   :  { %759 = vmatprep.subr.bf16.mxu0 %v2279_v26 }
  0x60   :  { %361 = vmatmul.mubr.bf16.gmra.mrb[12].mxu1 %v1890_v49 }
  0x61   :  { %384 = vmatpush1.bf16.msra.mxu1 %v1891_v50  ;;  %403 = vmatprep.mubr.bf16.mxu1 %v2861_v0 }
  0x62   :  { %385 = vmatprep.subr.bf16.mxu1 %v1896_v51  ;;  %760 = vmatpush1.bf16.msra.mxu0 %v2288_v29 }
  0x63   :  { %761 = vmatprep.subr.bf16.mxu0 %v2291_v30 }
  0x65   :  { %386 = vmatpush1.bf16.msra.mxu1 %v1894_v52 }
  0x66   :  { %677 = vmatprep.subr.bf16.mxu1 %v2383_v53  ;;  %762 = vmatpush1.bf16.msra.mxu0 %v2300_v33 }
  0x67   :  { %858 = vmatprep.subr.bf16.mxu0 %v2211_v3 }
  0x68   :  { %404 = vmatmul.mubr.bf16.vlgmr.msra.gmra.mrb[16].mxu1 %v2306_v34 }
  0x69   :  { %678 = vmatpush1.bf16.msra.mxu1 %v2387_v54  ;;  %413 = vmatprep.mubr.bf16.mxu1 %v2861_v0 }
  0x6a   :  { %679 = vmatprep.subr.bf16.mxu1 %v2390_v55 }
  0x6d   :  { %680 = vmatpush1.bf16.msra.mxu1 %v2396_v56 }
  0x6e   :  { %681 = vmatprep.subr.bf16.mxu1 %v2400_v57 }
  0x70   :  { %414 = vmatmul.mubr.bf16.gmra.mrb[20].mxu1 %v1876_v39 }
  0x71   :  { %682 = vmatpush1.bf16.msra.mxu1 %v2403_v58  ;;  %423 = vmatprep.mubr.bf16.mxu1 %v2861_v0 }
  0x72   :  { %683 = vmatprep.subr.bf16.mxu1 %v2406_v59 }
  0x75   :  { %684 = vmatpush1.bf16.msra.mxu1 %v2409_v60 }
  0x76   :  { %685 = vmatprep.subr.bf16.mxu1 %v2413_v61 }
  0x78   :  { %424 = vmatmul.mubr.bf16.gmra.mrb[24].mxu1 %v1883_v44 }
  0x79   :  { %686 = vmatpush1.bf16.msra.mxu1 %v2416_v62  ;;  %433 = vmatprep.mubr.bf16.mxu1 %v2861_v0 }
  0x7a   :  { %687 = vmatprep.subr.bf16.mxu1 %v2419_v63 }
  0x7d   :  { %688 = vmatpush1.bf16.msra.mxu1 %v2422_v1 }
  0x7e   :  { %689 = vmatprep.subr.bf16.mxu1 %v2426_v2 }
  0x80   :  { %434 = vmatmul.mubr.bf16.gmra.mrb[28].mxu1 %v1890_v49 }
  0x81   :  { %690 = vmatpush1.bf16.msra.mxu1 %v2429_v5  ;;  %709 = vmatprep.mubr.bf16.mxu1 %v2861_v0 }
  0x82   :  { %691 = vmatprep.subr.bf16.mxu1 %v2432_v6 }
  0x85   :  { %692 = vmatpush1.bf16.msra.mxu1 %v2435_v9 }
  0x86   :  { %788 = vmatprep.subr.bf16.mxu1 %v2383_v53 }
  0x88   :  { %710 = vmatmul.mubr.bf16.vlgmr.msra.gmra.mrb[32].mxu1 %v2861_v0 }
  0x89   :  { %789 = vmatpush1.bf16.msra.mxu1 %v2387_v54  ;;  %820 = vmatprep.mubr.bf16.mxu1 %v2861_v0 }
  0x8a   :  { %790 = vmatprep.subr.bf16.mxu1 %v2390_v55 }
  0x8d   :  { %791 = vmatpush1.bf16.msra.mxu1 %v2396_v56 }
  0x8e   :  { %792 = vmatprep.subr.bf16.mxu1 %v2400_v57 }
  0x91   :  { %793 = vmatpush1.bf16.msra.mxu1 %v2403_v58 }
  0x92   :  { %794 = vmatprep.subr.bf16.mxu1 %v2406_v59 }
  0x95   :  { %795 = vmatpush1.bf16.msra.mxu1 %v2409_v60 }
  0x96   :  { %796 = vmatprep.subr.bf16.mxu1 %v2413_v61 }
  0x99   :  { %797 = vmatpush1.bf16.msra.mxu1 %v2416_v62 }
  0x9a   :  { %798 = vmatprep.subr.bf16.mxu1 %v2419_v63 }
  0x9d   :  { %799 = vmatpush1.bf16.msra.mxu1 %v2422_v1 }
  0x9e   :  { %800 = vmatprep.subr.bf16.mxu1 %v2426_v2 }
  0xa1   :  { %801 = vmatpush1.bf16.msra.mxu1 %v2429_v5 }
  0xa2   :  { %802 = vmatprep.subr.bf16.mxu1 %v2432_v6 }
  0xa5   :  { %803 = vmatpush1.bf16.msra.mxu1 %v2435_v9 }
  0xa6   :  { %899 = vmatprep.subr.bf16.mxu1 %v2383_v53 }
 0x11b   :  { %v332_v24 = vpop.f32.mrb[0].mxu1  ;;  %v670_v34 = vpop.f32.mrb[0].mxu0 }
 0x11c   :  { %v333_v27 = vadd.f32 %v332_v24, %v97_v20  ;;  %v334_v28 = vpop.f32.mrb[1].mxu1  ;;  %v672_v38 = vpop.f32.mrb[1].mxu0 }
 0x11d   :  { %v335_v31 = vadd.f32 %v334_v28, %v101_v23  ;;  %v336_v32 = vpop.f32.mrb[2].mxu1  ;;  %v674_v41 = vpop.f32.mrb[2].mxu0 }
 0x11e   :  { %v2462_v35 = vadd.f32 %v336_v32, %v97_v20  ;;  %v718_v36 = vadd.f32 %v670_v34, %v333_v27  ;;  %v338_v37 = vpop.f32.mrb[3].mxu1  ;;  %v675_v42 = vpop.f32.mrb[3].mxu0 }
 0x11f   :  { %v2464_v39 = vadd.f32 %v338_v37, %v101_v23  ;;  %v719_v40 = vadd.f32 %v672_v38, %v335_v31 }
 0x123   :  { %v342_v43 = vpop.f32.mrb[4].mxu1 }
 0x124   :  { %v2466_v44 = vadd.f32 %v342_v43, %v97_v20  ;;  %v344_v45 = vpop.f32.mrb[5].mxu1 }
 0x125   :  { %v2468_v46 = vadd.f32 %v344_v45, %v101_v23  ;;  %v346_v47 = vpop.f32.mrb[6].mxu1  ;;  %v104_v45 = vsub.s32 2, %v95_v12 }
 0x126   :  { %v2470_v48 = vadd.f32 %v346_v47, %v97_v20  ;;  %v348_v49 = vpop.f32.mrb[7].mxu1  ;;  %v108_v47 = vsub.s32 3, %v95_v12 }
 0x127   :  { %v2472_v50 = vadd.f32 %v348_v49, %v101_v23 }
 0x129   :  { %2863 = vst [vmem:[#allocation8_spill] sm:$0xff] %v2472_v50 }
 0x12b   :  { %v352_v51 = vpop.f32.mrb[8].mxu1 }
 0x12c   :  { %v2474_v52 = vadd.f32 %v352_v51, %v97_v20  ;;  %v354_v10 = vpop.f32.mrb[9].mxu1  ;;  %v105_v51 = vrot.slane %v92_v16, %v104_v45 }
 0x12d   :  { %v2476_v15 = vadd.f32 %v354_v10, %v101_v23  ;;  %v356_v19 = vpop.f32.mrb[10].mxu1 }
 0x12e   :  { %2864 = vst [vmem:[#allocation9_spill] sm:$0xff] %v2474_v52  ;;  %v2478_v24 = vadd.f32 %v356_v19, %v97_v20  ;;  %v358_v27 = vpop.f32.mrb[11].mxu1  ;;  %v109_v19 = vrot.slane %v92_v16, %v108_v47  ;;  %v1745_v16 = vmul.f32 -1.442695, %v718_v36 }
 0x12f   :  { %2865 = vst [vmem:[#allocation10_spill] sm:$0xff] %v2476_v15  ;;  %v2480_v28 = vadd.f32 %v358_v27, %v101_v23 }
 0x130   :  { %2866 = vst [vmem:[#allocation11_spill] sm:$0xff] %v2478_v24 }
 0x131   :  { %2867 = vst [vmem:[#allocation12_spill] sm:$0xff] %v2480_v28 }
 0x133   :  { %v362_v31 = vpop.f32.mrb[12].mxu1 }
 0x134   :  { %v2482_v32 = vadd.f32 %v362_v31, %v97_v20  ;;  %v364_v34 = vpop.f32.mrb[13].mxu1 }
 0x135   :  { %v2484_v37 = vadd.f32 %v364_v34, %v101_v23  ;;  %v366_v38 = vpop.f32.mrb[14].mxu1 }
 0x136   :  { %2868 = vst [vmem:[#allocation13_spill] sm:$0xff] %v2482_v32  ;;  %v2486_v41 = vadd.f32 %v366_v38, %v97_v20  ;;  %v368_v42 = vpop.f32.mrb[15].mxu1 }
 0x137   :  { %2869 = vst [vmem:[#allocation14_spill] sm:$0xff] %v2484_v37  ;;  %v2488_v43 = vadd.f32 %v368_v42, %v101_v23 }
 0x138   :  { %2870 = vst [vmem:[#allocation15_spill] sm:$0xff] %v2486_v41 }
 0x139   :  { %2871 = vst [vmem:[#allocation16_spill] sm:$0xff] %v2488_v43  ;;  %v1746_v43 = vmul.f32 -1.442695, %v719_v40 }
 0x13b   :  { %v405_v49 = vpop.f32.mrb[16].mxu1  ;;  %1929 = vpow2.f32 %v1746_v43 }
 0x13c   :  { %v407_v10 = vpop.f32.mrb[17].mxu1  ;;  %1931 = vpow2.f32 %v1745_v16 }
 0x13d   :  { %v409_v27 = vpop.f32.mrb[18].mxu1  ;;  %v408_v52 = vadd.f32 %v407_v10, %v109_v19 }
 0x13e   :  { %v2490_v0 = vadd.f32 %v409_v27, %v105_v51  ;;  %v411_v31 = vpop.f32.mrb[19].mxu1 }
 0x13f   :  { %v2492_v32 = vadd.f32 %v411_v31, %v109_v19 }
 0x143   :  { %v415_v34 = vpop.f32.mrb[20].mxu1 }
 0x144   :  { %v2494_v37 = vadd.f32 %v415_v34, %v105_v51  ;;  %v417_v20 = vpop.f32.mrb[21].mxu1 }
 0x145   :  { %v2496_v38 = vadd.f32 %v417_v20, %v109_v19  ;;  %v419_v23 = vpop.f32.mrb[22].mxu1 }
 0x146   :  { %v2498_v42 = vadd.f32 %v419_v23, %v105_v51  ;;  %v421_v12 = vpop.f32.mrb[23].mxu1 }
 0x147   :  { %v2500_v45 = vadd.f32 %v421_v12, %v109_v19  ;;  %v1930_v12 = vpop.eup %1929 }
 0x148   :  { %v1932_v16 = vpop.eup %1931 }
 0x149   :  { %2872 = vst [vmem:[#allocation17_spill] sm:$0xff] %v2500_v45 }
 0x14b   :  { %v425_v47 = vpop.f32.mrb[24].mxu1 }
 0x14c   :  { %v2502_v27 = vadd.f32 %v425_v47, %v105_v51  ;;  %v427_v31 = vpop.f32.mrb[25].mxu1 }
 0x14d   :  { %v2504_v41 = vadd.f32 %v427_v31, %v109_v19  ;;  %v429_v34 = vpop.f32.mrb[26].mxu1 }
 0x14e   :  { %2873 = vst [vmem:[#allocation18_spill] sm:$0xff] %v2502_v27  ;;  %v2506_v28 = vadd.f32 %v429_v34, %v105_v51  ;;  %v431_v20 = vpop.f32.mrb[27].mxu1  ;;  %v725_v34 = vadd.f32 1.0, %v1932_v16 }
 0x14f   :  { %2874 = vst [vmem:[#allocation19_spill] sm:$0xff] %v2504_v41  ;;  %v2508_v24 = vadd.f32 %v431_v20, %v109_v19  ;;  %v731_v41 = vadd.f32 1.0, %v1930_v12 }
 0x150   :  { %2875 = vst [vmem:[#allocation20_spill] sm:$0xff] %v2506_v28  ;;  %v406_v28 = vadd.f32 %v405_v49, %v105_v51 }
 0x151   :  { %2876 = vst [vmem:[#allocation21_spill] sm:$0xff] %v2508_v24  ;;  %1933 = vrcp.f32 %v731_v41 }
 0x152   :  { %1935 = vrcp.f32 %v725_v34 }
 0x153   :  { %v435_v23 = vpop.f32.mrb[28].mxu1 }
 0x154   :  { %v2510_v15 = vadd.f32 %v435_v23, %v105_v51  ;;  %v437_v40 = vpop.f32.mrb[29].mxu1 }
 0x155   :  { %v2512_v36 = vadd.f32 %v437_v40, %v109_v19  ;;  %v439_v43 = vpop.f32.mrb[30].mxu1 }
 0x156   :  { %2877 = vst [vmem:[#allocation22_spill] sm:$0xff] %v2510_v15  ;;  %v2514_v47 = vadd.f32 %v439_v43, %v105_v51  ;;  %v441_v27 = vpop.f32.mrb[31].mxu1 }
 0x157   :  { %2878 = vst [vmem:[#allocation23_spill] sm:$0xff] %v2512_v36  ;;  %v2516_v31 = vadd.f32 %v441_v27, %v109_v19 }
 0x158   :  { %2879 = vst [vmem:[#allocation24_spill] sm:$0xff] %v2514_v47 }
 0x159   :  { %2880 = vst [vmem:[#allocation25_spill] sm:$0xff] %v2516_v31 }
 0x15b   :  { %v711_v20 = vpop.f32.mrb[32].mxu1  ;;  %v1934_v43 = vpop.eup %1933 }
 0x15c   :  { %v720_v24 = vadd.f32 %v711_v20, %v406_v28  ;;  %v713_v23 = vpop.f32.mrb[33].mxu1  ;;  %v1936_v47 = vpop.eup %1935  ;;  %v741_v27 = vmul.f32 0.0, %v1934_v43 }
 0x15d   :  { %v721_v15 = vadd.f32 %v713_v23, %v408_v52  ;;  %v715_v45 = vpop.f32.mrb[34].mxu1 }
 0x15e   :  { %1937 = vtanh.f32 %v720_v24  ;;  %v716_v40 = vpop.f32.mrb[35].mxu1 }
 0x15f   :  { %v1747_v36 = vmul.f32 -1.442695, %v721_v15 }
 0x161   :  { %1939 = vpow2.f32 %v1747_v36 }
 0x168   :  { %v1938_v50 = vpop.eup %1937 }
 0x169   :  { %v742_v31 = vmul.f32 %v1938_v50, %v1936_v47  ;;  %v2881_v50 = vmov 0  }
 0x16b   :  { %v1940_v12 = vpop.eup %1939  ;;  %v2518_v16 = vadd.f32 %v742_v31, %v741_v27 }
 0x16c   :  { %v738_v49 = vadd.f32 1.0, %v1940_v12 }
 0x16d   :  { %1941 = vtanh.f32 %v2518_v16 }
 0x16e   :  { %1943 = vrcp.f32 %v738_v49 }
 0x177   :  { %v1942_v28 = vpop.eup %1941 }
 0x178   :  { %v1944_v41 = vpop.eup %1943 }
 0x179   :  { %v2521_v52 = vmul.f32 %v1944_v41, %v1942_v28 }
 0x17b   :  { %v746_v15 = vpack.c.bf16 %v2521_v52, %v2521_v52 }
 0x17d   :  { %780 = vmatmul.mubr.bf16.vlgmr.msra.gmra.mrb[4].mxu0 %v746_v15  ;;  %821 = vmatmul.mubr.bf16.vlgmr.msra.gmra.mrb[36].mxu1 %v746_v15 }
 0x17e   :  { %859 = vmatpush1.bf16.msra.mxu0 %v2213_v4  ;;  %900 = vmatpush1.bf16.msra.mxu1 %v2387_v54 }
 0x17f   :  { %860 = vmatprep.subr.bf16.mxu0 %v2222_v7  ;;  %901 = vmatprep.subr.bf16.mxu1 %v2390_v55 }
 0x180   :  { %890 = vmatprep.mubr.bf16.mxu0 %v2881_v50  ;;  %931 = vmatprep.mubr.bf16.mxu1 %v2881_v50 }
 0x182   :  { %861 = vmatpush1.bf16.msra.mxu0 %v2225_v8  ;;  %902 = vmatpush1.bf16.msra.mxu1 %v2396_v56 }
 0x183   :  { %862 = vmatprep.subr.bf16.mxu0 %v2234_v11  ;;  %903 = vmatprep.subr.bf16.mxu1 %v2400_v57 }
 0x186   :  { %863 = vmatpush1.bf16.msra.mxu0 %v2240_v13  ;;  %904 = vmatpush1.bf16.msra.mxu1 %v2403_v58 }
 0x187   :  { %864 = vmatprep.subr.bf16.mxu0 %v2243_v14  ;;  %905 = vmatprep.subr.bf16.mxu1 %v2406_v59 }
 0x18a   :  { %865 = vmatpush1.bf16.msra.mxu0 %v2252_v17  ;;  %906 = vmatpush1.bf16.msra.mxu1 %v2409_v60 }
 0x18b   :  { %866 = vmatprep.subr.bf16.mxu0 %v2255_v18  ;;  %907 = vmatprep.subr.bf16.mxu1 %v2413_v61 }
 0x18e   :  { %867 = vmatpush1.bf16.msra.mxu0 %v2264_v21  ;;  %908 = vmatpush1.bf16.msra.mxu1 %v2416_v62 }
 0x18f   :  { %868 = vmatprep.subr.bf16.mxu0 %v2267_v22  ;;  %909 = vmatprep.subr.bf16.mxu1 %v2419_v63 }
 0x192   :  { %869 = vmatpush1.bf16.msra.mxu0 %v2276_v25  ;;  %910 = vmatpush1.bf16.msra.mxu1 %v2422_v1 }
 0x193   :  { %870 = vmatprep.subr.bf16.mxu0 %v2279_v26  ;;  %911 = vmatprep.subr.bf16.mxu1 %v2426_v2 }
 0x196   :  { %871 = vmatpush1.bf16.msra.mxu0 %v2288_v29  ;;  %912 = vmatpush1.bf16.msra.mxu1 %v2429_v5 }
 0x197   :  { %872 = vmatprep.subr.bf16.mxu0 %v2291_v30  ;;  %913 = vmatprep.subr.bf16.mxu1 %v2432_v6 }
 0x19a   :  { %873 = vmatpush1.bf16.msra.mxu0 %v2300_v33  ;;  %914 = vmatpush1.bf16.msra.mxu1 %v2435_v9 }
 0x19b   :  { %969 = vmatprep.subr.bf16.mxu0 %v2211_v3  ;;  %1010 = vmatprep.subr.bf16.mxu1 %v2383_v53 }
 0x250   :  { %v781_v24 = vpop.f32.mrb[4].mxu0  ;;  %v822_v51 = vpop.f32.mrb[36].mxu1 }
 0x251   :  { %v829_v10 = vadd.f32 %v781_v24, %v2462_v35  ;;  %v831_v19 = vadd.f32 %v822_v51, %v2490_v0  ;;  %v783_v45 = vpop.f32.mrb[5].mxu0  ;;  %v824_v36 = vpop.f32.mrb[37].mxu1 }
 0x252   :  { %v830_v47 = vadd.f32 %v783_v45, %v2464_v39  ;;  %v832_v31 = vadd.f32 %v824_v36, %v2492_v32  ;;  %v785_v34 = vpop.f32.mrb[6].mxu0  ;;  %v826_v20 = vpop.f32.mrb[38].mxu1 }
 0x253   :  { %v1748_v23 = vmul.f32 -1.442695, %v829_v10  ;;  %v786_v40 = vpop.f32.mrb[7].mxu0  ;;  %v827_v43 = vpop.f32.mrb[39].mxu1 }
 0x254   :  { %v1749_v27 = vmul.f32 -1.442695, %v830_v47  ;;  %v1750_v12 = vmul.f32 -1.442695, %v832_v31 }
 0x255   :  { %1945 = vpow2.f32 %v1748_v23 }
 0x256   :  { %1947 = vpow2.f32 %v1749_v27 }
 0x257   :  { %1949 = vpow2.f32 %v1750_v12 }
 0x258   :  { %1951 = vtanh.f32 %v831_v19 }
 0x25f   :  { %v1946_v49 = vpop.eup %1945 }
 0x260   :  { %v1948_v28 = vpop.eup %1947  ;;  %v836_v35 = vadd.f32 1.0, %v1946_v49 }
 0x261   :  { %v842_v0 = vadd.f32 1.0, %v1948_v28  ;;  %v1950_v39 = vpop.eup %1949 }
 0x262   :  { %1953 = vrcp.f32 %v836_v35  ;;  %v1952_v41 = vpop.eup %1951  ;;  %v849_v51 = vadd.f32 1.0, %v1950_v39 }
 0x263   :  { %1955 = vrcp.f32 %v842_v0 }
 0x264   :  { %1957 = vrcp.f32 %v849_v51 }
 0x26c   :  { %v1954_v32 = vpop.eup %1953 }
 0x26d   :  { %v1956_v15 = vpop.eup %1955  ;;  %v853_v24 = vmul.f32 %v1954_v32, %v1952_v41 }
 0x26e   :  { %v852_v10 = vmul.f32 %v1956_v15, %v2518_v16  ;;  %v1958_v36 = vpop.eup %1957 }
 0x270   :  { %v2564_v45 = vadd.f32 %v853_v24, %v852_v10 }
 0x272   :  { %1959 = vtanh.f32 %v2564_v45 }
 0x27c   :  { %v1960_v47 = vpop.eup %1959 }
 0x27d   :  { %v2567_v31 = vmul.f32 %v1960_v47, %v1958_v36  ;;  %v2617_v47 = vld [vmem:[#allocation2] ss:$16 sps:$4 sm:$0xff]  }
 0x27f   :  { %v857_v19 = vpack.c.bf16 %v2567_v31, %v2567_v31 }
 0x281   :  { %891 = vmatmul.mubr.bf16.vlgmr.msra.gmra.mrb[8].mxu0 %v857_v19  ;;  %932 = vmatmul.mubr.bf16.vlgmr.msra.gmra.mrb[40].mxu1 %v857_v19  ;;  %v2627_v19 = vld [vmem:[#allocation2 + $0x20] ss:$16 sps:$4 sm:$0xff]  }
 0x282   :  { %970 = vmatpush1.bf16.msra.mxu0 %v2213_v4  ;;  %1011 = vmatpush1.bf16.msra.mxu1 %v2387_v54 }
 0x283   :  { %971 = vmatprep.subr.bf16.mxu0 %v2222_v7  ;;  %1012 = vmatprep.subr.bf16.mxu1 %v2390_v55 }
 0x284   :  { %1001 = vmatprep.mubr.bf16.mxu0 %v2881_v50  ;;  %1042 = vmatprep.mubr.bf16.mxu1 %v2881_v50 }
 0x286   :  { %972 = vmatpush1.bf16.msra.mxu0 %v2225_v8  ;;  %1013 = vmatpush1.bf16.msra.mxu1 %v2396_v56 }
 0x287   :  { %973 = vmatprep.subr.bf16.mxu0 %v2234_v11  ;;  %1014 = vmatprep.subr.bf16.mxu1 %v2400_v57 }
 0x28a   :  { %974 = vmatpush1.bf16.msra.mxu0 %v2240_v13  ;;  %1015 = vmatpush1.bf16.msra.mxu1 %v2403_v58 }
 0x28b   :  { %975 = vmatprep.subr.bf16.mxu0 %v2243_v14  ;;  %1016 = vmatprep.subr.bf16.mxu1 %v2406_v59 }
 0x28e   :  { %976 = vmatpush1.bf16.msra.mxu0 %v2252_v17  ;;  %1017 = vmatpush1.bf16.msra.mxu1 %v2409_v60 }
 0x28f   :  { %977 = vmatprep.subr.bf16.mxu0 %v2255_v18  ;;  %1018 = vmatprep.subr.bf16.mxu1 %v2413_v61 }
 0x292   :  { %978 = vmatpush1.bf16.msra.mxu0 %v2264_v21  ;;  %1019 = vmatpush1.bf16.msra.mxu1 %v2416_v62 }
 0x293   :  { %979 = vmatprep.subr.bf16.mxu0 %v2267_v22  ;;  %1020 = vmatprep.subr.bf16.mxu1 %v2419_v63 }
 0x296   :  { %980 = vmatpush1.bf16.msra.mxu0 %v2276_v25  ;;  %1021 = vmatpush1.bf16.msra.mxu1 %v2422_v1 }
 0x297   :  { %981 = vmatprep.subr.bf16.mxu0 %v2279_v26  ;;  %1022 = vmatprep.subr.bf16.mxu1 %v2426_v2 }
 0x29a   :  { %982 = vmatpush1.bf16.msra.mxu0 %v2288_v29  ;;  %1023 = vmatpush1.bf16.msra.mxu1 %v2429_v5 }
 0x29b   :  { %983 = vmatprep.subr.bf16.mxu0 %v2291_v30  ;;  %1024 = vmatprep.subr.bf16.mxu1 %v2432_v6 }
 0x29e   :  { %984 = vmatpush1.bf16.msra.mxu0 %v2300_v33  ;;  %1025 = vmatpush1.bf16.msra.mxu1 %v2435_v9 }
 0x29f   :  { %1080 = vmatprep.subr.bf16.mxu0 %v2211_v3  ;;  %1121 = vmatprep.subr.bf16.mxu1 %v2383_v53 }
 0x354   :  { %v892_v4 = vpop.f32.mrb[8].mxu0  ;;  %v933_v7 = vpop.f32.mrb[40].mxu1 }
 0x355   :  { %v940_v8 = vadd.f32 %v892_v4, %v2466_v44  ;;  %v942_v11 = vadd.f32 %v933_v7, %v2494_v37  ;;  %v894_v13 = vpop.f32.mrb[9].mxu0  ;;  %v935_v14 = vpop.f32.mrb[41].mxu1  ;;  %v2631_v4 = vld [vmem:[#allocation2 + $0x44] ss:$16 sps:$4 sm:$0xff]   ;;  %v2635_v7 = vld [vmem:[#allocation2 + $0x40] ss:$16 sps:$4 sm:$0xff]  }
 0x356   :  { %v941_v16 = vadd.f32 %v894_v13, %v2468_v46  ;;  %v943_v34 = vadd.f32 %v935_v14, %v2496_v38  ;;  %v896_v20 = vpop.f32.mrb[10].mxu0  ;;  %v937_v23 = vpop.f32.mrb[42].mxu1  ;;  %v2883_v13 = vld [vmem:[#allocation17_spill] sm:$0xff] }
 0x357   :  { %v1751_v40 = vmul.f32 -1.442695, %v940_v8  ;;  %v897_v43 = vpop.f32.mrb[11].mxu0  ;;  %v938_v27 = vpop.f32.mrb[43].mxu1  ;;  %v2639_v8 = vld [vmem:[#allocation2 + $0x64] ss:$16 sps:$4 sm:$0xff]  }
 0x358   :  { %v1752_v3 = vmul.f32 -1.442695, %v941_v16  ;;  %v1753_v12 = vmul.f32 -1.442695, %v943_v34 }
 0x359   :  { %1961 = vpow2.f32 %v1751_v40 }
 0x35a   :  { %1963 = vpow2.f32 %v1752_v3 }
 0x35b   :  { %1965 = vpow2.f32 %v1753_v12 }
 0x35c   :  { %1967 = vtanh.f32 %v942_v11 }
 0x363   :  { %v1962_v49 = vpop.eup %1961 }
 0x364   :  { %v1964_v28 = vpop.eup %1963  ;;  %v947_v44 = vadd.f32 1.0, %v1962_v49 }
 0x365   :  { %v953_v37 = vadd.f32 1.0, %v1964_v28  ;;  %v1966_v46 = vpop.eup %1965 }
 0x366   :  { %1969 = vrcp.f32 %v947_v44  ;;  %v1968_v35 = vpop.eup %1967  ;;  %v960_v41 = vadd.f32 1.0, %v1966_v46 }
 0x367   :  { %1971 = vrcp.f32 %v953_v37 }
 0x368   :  { %1973 = vrcp.f32 %v960_v41 }
 0x370   :  { %v1970_v38 = vpop.eup %1969 }
 0x371   :  { %v1972_v0 = vpop.eup %1971  ;;  %v964_v39 = vmul.f32 %v1970_v38, %v1968_v35 }
 0x372   :  { %v963_v32 = vmul.f32 %v1972_v0, %v2564_v45  ;;  %v1974_v24 = vpop.eup %1973  ;;  %v2621_v45 = vld [vmem:[#allocation2 + $0x24] ss:$16 sps:$4 sm:$0xff]  }
 0x374   :  { %v2610_v15 = vadd.f32 %v964_v39, %v963_v32 }
 0x376   :  { %1975 = vtanh.f32 %v2610_v15 }
 0x380   :  { %v1976_v51 = vpop.eup %1975 }
 0x381   :  { %v2613_v10 = vmul.f32 %v1976_v51, %v1974_v24  ;;  %v2695_v24 = vld [vmem:[#allocation2 + $0x84] ss:$16 sps:$4 sm:$0xff]   ;;  %v2699_v51 = vld [vmem:[#allocation2 + $0x80] ss:$16 sps:$4 sm:$0xff]  }
 0x383   :  { %v968_v36 = vpack.c.bf16 %v2613_v10, %v2613_v10 }
 0x385   :  { %1002 = vmatmul.mubr.bf16.vlgmr.msra.gmra.mrb[12].mxu0 %v968_v36  ;;  %1043 = vmatmul.mubr.bf16.vlgmr.msra.gmra.mrb[44].mxu1 %v968_v36  ;;  %v2703_v36 = vld [vmem:[#allocation2 + $0xa4] ss:$16 sps:$4 sm:$0xff]  }
 0x386   :  { %1081 = vmatpush1.bf16.msra.mxu0 %v2617_v47  ;;  %1122 = vmatpush1.bf16.msra.mxu1 %v2387_v54 }
 0x387   :  { %1082 = vmatprep.subr.bf16.mxu0 %v2621_v45  ;;  %1123 = vmatprep.subr.bf16.mxu1 %v2390_v55 }
 0x388   :  { %1112 = vmatprep.mubr.bf16.mxu0 %v2881_v50  ;;  %1153 = vmatprep.mubr.bf16.mxu1 %v2881_v50 }
 0x38a   :  { %1083 = vmatpush1.bf16.msra.mxu0 %v2627_v19  ;;  %1124 = vmatpush1.bf16.msra.mxu1 %v2396_v56 }
 0x38b   :  { %1084 = vmatprep.subr.bf16.mxu0 %v2631_v4  ;;  %1125 = vmatprep.subr.bf16.mxu1 %v2400_v57 }
 0x38e   :  { %1085 = vmatpush1.bf16.msra.mxu0 %v2635_v7  ;;  %1126 = vmatpush1.bf16.msra.mxu1 %v2403_v58 }
 0x38f   :  { %1086 = vmatprep.subr.bf16.mxu0 %v2639_v8  ;;  %1127 = vmatprep.subr.bf16.mxu1 %v2406_v59 }
 0x392   :  { %1087 = vmatpush1.bf16.msra.mxu0 %v2252_v17  ;;  %1128 = vmatpush1.bf16.msra.mxu1 %v2409_v60  ;;  %v2661_v17 = vld [vmem:[#allocation2 + $0x4] ss:$16 sps:$4 sm:$0xff]  }
 0x393   :  { %1088 = vmatprep.subr.bf16.mxu0 %v2255_v18  ;;  %1129 = vmatprep.subr.bf16.mxu1 %v2413_v61 }
 0x396   :  { %1089 = vmatpush1.bf16.msra.mxu0 %v2264_v21  ;;  %1130 = vmatpush1.bf16.msra.mxu1 %v2416_v62 }
 0x397   :  { %1090 = vmatprep.subr.bf16.mxu0 %v2267_v22  ;;  %1131 = vmatprep.subr.bf16.mxu1 %v2419_v63 }
 0x39a   :  { %1091 = vmatpush1.bf16.msra.mxu0 %v2276_v25  ;;  %1132 = vmatpush1.bf16.msra.mxu1 %v2422_v1 }
 0x39b   :  { %1092 = vmatprep.subr.bf16.mxu0 %v2279_v26  ;;  %1133 = vmatprep.subr.bf16.mxu1 %v2426_v2 }
 0x39e   :  { %1093 = vmatpush1.bf16.msra.mxu0 %v2288_v29  ;;  %1134 = vmatpush1.bf16.msra.mxu1 %v2429_v5 }
 0x39f   :  { %1094 = vmatprep.subr.bf16.mxu0 %v2291_v30  ;;  %1135 = vmatprep.subr.bf16.mxu1 %v2432_v6  ;;  %v2882_v30 = vld [vmem:[#allocation8_spill] sm:$0xff] }
 0x3a2   :  { %1095 = vmatpush1.bf16.msra.mxu0 %v2300_v33  ;;  %1136 = vmatpush1.bf16.msra.mxu1 %v2435_v9 }
 0x3a3   :  { %1191 = vmatprep.subr.bf16.mxu0 %v2661_v17  ;;  %1232 = vmatprep.subr.bf16.mxu1 %v2383_v53 }
 0x458   :  { %v1003_v18 = vpop.f32.mrb[12].mxu0  ;;  %v1044_v21 = vpop.f32.mrb[44].mxu1 }
 0x459   :  { %v1051_v22 = vadd.f32 %v1003_v18, %v2470_v48  ;;  %v1053_v25 = vadd.f32 %v1044_v21, %v2498_v42  ;;  %v1005_v26 = vpop.f32.mrb[13].mxu0  ;;  %v1046_v29 = vpop.f32.mrb[45].mxu1  ;;  %v2707_v18 = vld [vmem:[#allocation2 + $0xa0] ss:$16 sps:$4 sm:$0xff]   ;;  %v2711_v21 = vld [vmem:[#allocation2 + $0xc4] ss:$16 sps:$4 sm:$0xff]  }
 0x45a   :  { %v1052_v11 = vadd.f32 %v1005_v26, %v2882_v30  ;;  %v1054_v33 = vadd.f32 %v1046_v29, %v2883_v13  ;;  %v1007_v14 = vpop.f32.mrb[14].mxu0  ;;  %v1048_v16 = vpop.f32.mrb[46].mxu1  ;;  %v2723_v26 = vld [vmem:[#allocation2 + $0xe0] ss:$16 sps:$4 sm:$0xff]  }
 0x45b   :  { %v1754_v34 = vmul.f32 -1.442695, %v1051_v22  ;;  %v1008_v20 = vpop.f32.mrb[15].mxu0  ;;  %v1049_v23 = vpop.f32.mrb[47].mxu1  ;;  %v2715_v22 = vld [vmem:[#allocation2 + $0xc0] ss:$16 sps:$4 sm:$0xff]  }
 0x45c   :  { %v1755_v40 = vmul.f32 -1.442695, %v1052_v11  ;;  %v1756_v43 = vmul.f32 -1.442695, %v1054_v33  ;;  %v2884_v11 = vld [vmem:[#allocation9_spill] sm:$0xff]  ;;  %v2885_v33 = vld [vmem:[#allocation18_spill] sm:$0xff] }
 0x45d   :  { %1977 = vpow2.f32 %v1754_v34  ;;  %v2886_v20 = vld [vmem:[#allocation10_spill] sm:$0xff] }
 0x45e   :  { %1979 = vpow2.f32 %v1755_v40  ;;  %v2887_v40 = vld [vmem:[#allocation19_spill] sm:$0xff] }
 0x45f   :  { %1981 = vpow2.f32 %v1756_v43 }
 0x460   :  { %1983 = vtanh.f32 %v1053_v25  ;;  %v2719_v25 = vld [vmem:[#allocation2 + $0xe4] ss:$16 sps:$4 sm:$0xff]  }
 0x467   :  { %v1978_v27 = vpop.eup %1977 }
 0x468   :  { %v1980_v3 = vpop.eup %1979  ;;  %v1058_v48 = vadd.f32 1.0, %v1978_v27 }
 0x469   :  { %v1064_v42 = vadd.f32 1.0, %v1980_v3  ;;  %v1982_v12 = vpop.eup %1981 }
 0x46a   :  { %1985 = vrcp.f32 %v1058_v48  ;;  %v1984_v49 = vpop.eup %1983  ;;  %v1071_v46 = vadd.f32 1.0, %v1982_v12 }
 0x46b   :  { %1987 = vrcp.f32 %v1064_v42 }
 0x46c   :  { %1989 = vrcp.f32 %v1071_v46 }
 0x474   :  { %v1986_v28 = vpop.eup %1985 }
 0x475   :  { %v1988_v44 = vpop.eup %1987  ;;  %v1075_v37 = vmul.f32 %v1986_v28, %v1984_v49 }
 0x476   :  { %v1074_v35 = vmul.f32 %v1988_v44, %v2610_v15  ;;  %v1990_v0 = vpop.eup %1989  ;;  %v2691_v15 = vld [vmem:[#allocation2 + $0x60] ss:$16 sps:$4 sm:$0xff]  }
 0x478   :  { %v2670_v38 = vadd.f32 %v1075_v37, %v1074_v35 }
 0x47a   :  { %1991 = vtanh.f32 %v2670_v38 }
 0x484   :  { %v1992_v39 = vpop.eup %1991 }
 0x485   :  { %v2673_v41 = vmul.f32 %v1992_v39, %v1990_v0 }
 0x487   :  { %v1079_v32 = vpack.c.bf16 %v2673_v41, %v2673_v41 }
 0x489   :  { %1113 = vmatmul.mubr.bf16.vlgmr.msra.gmra.mrb[16].mxu0 %v1079_v32  ;;  %1154 = vmatmul.mubr.bf16.vlgmr.msra.gmra.mrb[48].mxu1 %v1079_v32 }
 0x48a   :  { %1192 = vmatpush1.bf16.msra.mxu0 %v2617_v47  ;;  %1233 = vmatpush1.bf16.msra.mxu1 %v2387_v54 }
 0x48b   :  { %1193 = vmatprep.subr.bf16.mxu0 %v2621_v45  ;;  %1234 = vmatprep.subr.bf16.mxu1 %v2390_v55 }
 0x48c   :  { %1223 = vmatprep.mubr.bf16.mxu0 %v2881_v50  ;;  %1264 = vmatprep.mubr.bf16.mxu1 %v2881_v50 }
 0x48e   :  { %1194 = vmatpush1.bf16.msra.mxu0 %v2627_v19  ;;  %1235 = vmatpush1.bf16.msra.mxu1 %v2396_v56 }
 0x48f   :  { %1195 = vmatprep.subr.bf16.mxu0 %v2631_v4  ;;  %1236 = vmatprep.subr.bf16.mxu1 %v2400_v57 }
 0x492   :  { %1196 = vmatpush1.bf16.msra.mxu0 %v2635_v7  ;;  %1237 = vmatpush1.bf16.msra.mxu1 %v2403_v58 }
 0x493   :  { %1197 = vmatprep.subr.bf16.mxu0 %v2639_v8  ;;  %1238 = vmatprep.subr.bf16.mxu1 %v2406_v59 }
 0x496   :  { %1198 = vmatpush1.bf16.msra.mxu0 %v2691_v15  ;;  %1239 = vmatpush1.bf16.msra.mxu1 %v2409_v60 }
 0x497   :  { %1199 = vmatprep.subr.bf16.mxu0 %v2695_v24  ;;  %1240 = vmatprep.subr.bf16.mxu1 %v2413_v61 }
 0x49a   :  { %1200 = vmatpush1.bf16.msra.mxu0 %v2699_v51  ;;  %1241 = vmatpush1.bf16.msra.mxu1 %v2416_v62 }
 0x49b   :  { %1201 = vmatprep.subr.bf16.mxu0 %v2703_v36  ;;  %1242 = vmatprep.subr.bf16.mxu1 %v2419_v63 }
 0x49e   :  { %1202 = vmatpush1.bf16.msra.mxu0 %v2707_v18  ;;  %1243 = vmatpush1.bf16.msra.mxu1 %v2422_v1 }
 0x49f   :  { %1203 = vmatprep.subr.bf16.mxu0 %v2711_v21  ;;  %1244 = vmatprep.subr.bf16.mxu1 %v2426_v2 }
 0x4a2   :  { %1204 = vmatpush1.bf16.msra.mxu0 %v2715_v22  ;;  %1245 = vmatpush1.bf16.msra.mxu1 %v2429_v5 }
 0x4a3   :  { %1205 = vmatprep.subr.bf16.mxu0 %v2719_v25  ;;  %1246 = vmatprep.subr.bf16.mxu1 %v2432_v6 }
 0x4a6   :  { %1206 = vmatpush1.bf16.msra.mxu0 %v2723_v26  ;;  %1247 = vmatpush1.bf16.msra.mxu1 %v2435_v9 }
 0x4a7   :  { %1302 = vmatprep.subr.bf16.mxu0 %v2661_v17  ;;  %1343 = vmatprep.subr.bf16.mxu1 %v2383_v53 }
 0x55c   :  { %v1114_v29 = vpop.f32.mrb[16].mxu0  ;;  %v1155_v30 = vpop.f32.mrb[48].mxu1 }
 0x55d   :  { %v1162_v13 = vadd.f32 %v1114_v29, %v2884_v11  ;;  %v1164_v14 = vadd.f32 %v1155_v30, %v2885_v33  ;;  %v1116_v16 = vpop.f32.mrb[17].mxu0  ;;  %v1157_v34 = vpop.f32.mrb[49].mxu1 }
 0x55e   :  { %v1163_v23 = vadd.f32 %v1116_v16, %v2886_v20  ;;  %v1165_v43 = vadd.f32 %v1157_v34, %v2887_v40  ;;  %v1118_v27 = vpop.f32.mrb[18].mxu0  ;;  %v1159_v3 = vpop.f32.mrb[50].mxu1 }
 0x55f   :  { %v1757_v48 = vmul.f32 -1.442695, %v1162_v13  ;;  %v1119_v42 = vpop.f32.mrb[19].mxu0  ;;  %v1160_v12 = vpop.f32.mrb[51].mxu1 }
 0x560   :  { %v1758_v49 = vmul.f32 -1.442695, %v1163_v23  ;;  %v1759_v53 = vmul.f32 -1.442695, %v1165_v43 }
 0x561   :  { %1993 = vpow2.f32 %v1757_v48 }
 0x562   :  { %1995 = vpow2.f32 %v1758_v49 }
 0x563   :  { %1997 = vpow2.f32 %v1759_v53 }
 0x564   :  { %1999 = vtanh.f32 %v1164_v14 }
 0x56b   :  { %v1994_v28 = vpop.eup %1993 }
 0x56c   :  { %v1996_v44 = vpop.eup %1995  ;;  %v1169_v37 = vadd.f32 1.0, %v1994_v28 }
 0x56d   :  { %v1175_v46 = vadd.f32 1.0, %v1996_v44  ;;  %v1998_v35 = vpop.eup %1997 }
 0x56e   :  { %2001 = vrcp.f32 %v1169_v37  ;;  %v2000_v0 = vpop.eup %1999  ;;  %v1182_v30 = vadd.f32 1.0, %v1998_v35 }
 0x56f   :  { %2003 = vrcp.f32 %v1175_v46 }
 0x570   :  { %2005 = vrcp.f32 %v1182_v30  ;;  %v2075_v30 = vld [vmem:[#allocation2 + $0x2c] ss:$16 sps:$4 sm:$0xff]  }
 0x578   :  { %v2002_v39 = vpop.eup %2001 }
 0x579   :  { %v2004_v32 = vpop.eup %2003  ;;  %v1186_v29 = vmul.f32 %v2002_v39, %v2000_v0 }
 0x57a   :  { %v1185_v11 = vmul.f32 %v2004_v32, %v2670_v38  ;;  %v2006_v33 = vpop.eup %2005 }
 0x57c   :  { %v2734_v13 = vadd.f32 %v1186_v29, %v1185_v11  ;;  %v2074_v29 = vld [vmem:[#allocation2 + $0x8] ss:$16 sps:$4 sm:$0xff]  }
 0x57d   :  { %v2076_v11 = vld [vmem:[#allocation2 + $0x28] ss:$16 sps:$4 sm:$0xff]  }
 0x57e   :  { %2007 = vtanh.f32 %v2734_v13 }
 0x588   :  { %v2008_v16 = vpop.eup %2007 }
 0x589   :  { %v2737_v34 = vmul.f32 %v2008_v16, %v2006_v33  ;;  %v2080_v33 = vld [vmem:[#allocation2 + $0x68] ss:$16 sps:$4 sm:$0xff]  }
 0x58b   :  { %v1190_v14 = vpack.c.bf16 %v2737_v34, %v2737_v34 }
 0x58d   :  { %1224 = vmatmul.mubr.bf16.vlgmr.msra.gmra.mrb[20].mxu0 %v1190_v14  ;;  %1265 = vmatmul.mubr.bf16.vlgmr.msra.gmra.mrb[52].mxu1 %v1190_v14  ;;  %v2892_v14 = vld [vmem:[#allocation13_spill] sm:$0xff] }
 0x58e   :  { %1303 = vmatpush1.bf16.msra.mxu0 %v2617_v47  ;;  %1344 = vmatpush1.bf16.msra.mxu1 %v2387_v54  ;;  %v2073_v54 = vld [vmem:[#allocation2 + $0xc] ss:$16 sps:$4 sm:$0xff]  }
 0x58f   :  { %1304 = vmatprep.subr.bf16.mxu0 %v2621_v45  ;;  %1345 = vmatprep.subr.bf16.mxu1 %v2390_v55 }
 0x590   :  { %1334 = vmatprep.mubr.bf16.mxu0 %v2881_v50  ;;  %1375 = vmatprep.mubr.bf16.mxu1 %v2881_v50 }
 0x592   :  { %1305 = vmatpush1.bf16.msra.mxu0 %v2627_v19  ;;  %1346 = vmatpush1.bf16.msra.mxu1 %v2396_v56 }
 0x593   :  { %1306 = vmatprep.subr.bf16.mxu0 %v2631_v4  ;;  %1347 = vmatprep.subr.bf16.mxu1 %v2400_v57  ;;  %v2888_v57 = vld [vmem:[#allocation11_spill] sm:$0xff] }
 0x596   :  { %1307 = vmatpush1.bf16.msra.mxu0 %v2635_v7  ;;  %1348 = vmatpush1.bf16.msra.mxu1 %v2403_v58 }
 0x597   :  { %1308 = vmatprep.subr.bf16.mxu0 %v2639_v8  ;;  %1349 = vmatprep.subr.bf16.mxu1 %v2406_v59  ;;  %v2889_v59 = vld [vmem:[#allocation20_spill] sm:$0xff] }
 0x59a   :  { %1309 = vmatpush1.bf16.msra.mxu0 %v2691_v15  ;;  %1350 = vmatpush1.bf16.msra.mxu1 %v2409_v60 }
 0x59b   :  { %1310 = vmatprep.subr.bf16.mxu0 %v2695_v24  ;;  %1351 = vmatprep.subr.bf16.mxu1 %v2413_v61 }
 0x59e   :  { %1311 = vmatpush1.bf16.msra.mxu0 %v2699_v51  ;;  %1352 = vmatpush1.bf16.msra.mxu1 %v2416_v62 }
 0x59f   :  { %1312 = vmatprep.subr.bf16.mxu0 %v2703_v36  ;;  %1353 = vmatprep.subr.bf16.mxu1 %v2419_v63  ;;  %v2890_v63 = vld [vmem:[#allocation12_spill] sm:$0xff] }
 0x5a2   :  { %1313 = vmatpush1.bf16.msra.mxu0 %v2707_v18  ;;  %1354 = vmatpush1.bf16.msra.mxu1 %v2422_v1 }
 0x5a3   :  { %1314 = vmatprep.subr.bf16.mxu0 %v2711_v21  ;;  %1355 = vmatprep.subr.bf16.mxu1 %v2426_v2  ;;  %v2891_v2 = vld [vmem:[#allocation21_spill] sm:$0xff] }
 0x5a6   :  { %1315 = vmatpush1.bf16.msra.mxu0 %v2715_v22  ;;  %1356 = vmatpush1.bf16.msra.mxu1 %v2429_v5 }
 0x5a7   :  { %1316 = vmatprep.subr.bf16.mxu0 %v2719_v25  ;;  %1357 = vmatprep.subr.bf16.mxu1 %v2432_v6 }
 0x5aa   :  { %1317 = vmatpush1.bf16.msra.mxu0 %v2723_v26  ;;  %1358 = vmatpush1.bf16.msra.mxu1 %v2435_v9 }
 0x5ab   :  { %1413 = vmatprep.subr.bf16.mxu0 %v2661_v17  ;;  %1454 = vmatprep.subr.bf16.mxu1 %v2073_v54  ;;  %v2893_v54 = vld [vmem:[#allocation22_spill] sm:$0xff] }
 0x660   :  { %v1225_v55 = vpop.f32.mrb[20].mxu0  ;;  %v1266_v56 = vpop.f32.mrb[52].mxu1 }
 0x661   :  { %v1273_v58 = vadd.f32 %v1225_v55, %v2888_v57  ;;  %v1275_v60 = vadd.f32 %v1266_v56, %v2889_v59  ;;  %v1227_v61 = vpop.f32.mrb[21].mxu0  ;;  %v1268_v62 = vpop.f32.mrb[53].mxu1  ;;  %v2894_v57 = vld [vmem:[#allocation14_spill] sm:$0xff]  ;;  %v2895_v59 = vld [vmem:[#allocation23_spill] sm:$0xff] }
 0x662   :  { %v1274_v1 = vadd.f32 %v1227_v61, %v2890_v63  ;;  %v1276_v5 = vadd.f32 %v1268_v62, %v2891_v2  ;;  %v1229_v6 = vpop.f32.mrb[22].mxu0  ;;  %v1270_v38 = vpop.f32.mrb[54].mxu1 }
 0x663   :  { %v1760_v20 = vmul.f32 -1.442695, %v1273_v58  ;;  %v1230_v9 = vpop.f32.mrb[23].mxu0  ;;  %v1271_v23 = vpop.f32.mrb[55].mxu1 }
 0x664   :  { %v1761_v17 = vmul.f32 -1.442695, %v1274_v1  ;;  %v1762_v40 = vmul.f32 -1.442695, %v1276_v5 }
 0x665   :  { %2009 = vpow2.f32 %v1760_v20 }
 0x666   :  { %2011 = vpow2.f32 %v1761_v17 }
 0x667   :  { %2013 = vpow2.f32 %v1762_v40 }
 0x668   :  { %2015 = vtanh.f32 %v1275_v60 }
 0x66f   :  { %v2010_v43 = vpop.eup %2009 }
 0x670   :  { %v2012_v27 = vpop.eup %2011  ;;  %v1280_v3 = vadd.f32 1.0, %v2010_v43 }
 0x671   :  { %v1286_v48 = vadd.f32 1.0, %v2012_v27  ;;  %v2014_v42 = vpop.eup %2013 }
 0x672   :  { %2017 = vrcp.f32 %v1280_v3  ;;  %v2016_v12 = vpop.eup %2015  ;;  %v1293_v44 = vadd.f32 1.0, %v2014_v42 }
 0x673   :  { %2019 = vrcp.f32 %v1286_v48 }
 0x674   :  { %2021 = vrcp.f32 %v1293_v44  ;;  %v1523_v44 = vpack.c.bf16 %v2567_v31, %v2521_v52  ;;  %v1928_v52 = vld [vmem:[#allocation4 + $0x38] sm:$0xff]   ;;  %v1524_v31 = vpack.c.bf16 %v2673_v41, %v2613_v10 }
 0x67c   :  { %v2018_v49 = vpop.eup %2017 }
 0x67d   :  { %v2020_v53 = vpop.eup %2019  ;;  %v1297_v28 = vmul.f32 %v2018_v49, %v2016_v12 }
 0x67e   :  { %v1296_v37 = vmul.f32 %v2020_v53, %v2734_v13  ;;  %v2022_v35 = vpop.eup %2021  ;;  %v2077_v13 = vld [vmem:[#allocation2 + $0x4c] ss:$16 sps:$4 sm:$0xff]  }
 0x680   :  { %v2779_v46 = vadd.f32 %v1297_v28, %v1296_v37  ;;  %v1922_v28 = vld [vmem:[#allocation4 + $0x8] sm:$0xff]   ;;  %v1923_v37 = vld [vmem:[#allocation4 + $0x10] sm:$0xff]  }
 0x682   :  { %2023 = vtanh.f32 %v2779_v46 }
 0x68c   :  { %v2024_v0 = vpop.eup %2023 }
 0x68d   :  { %v2782_v39 = vmul.f32 %v2024_v0, %v2022_v35  ;;  %v1925_v35 = vld [vmem:[#allocation4 + $0x20] sm:$0xff]   ;;  %v1926_v0 = vld [vmem:[#allocation4 + $0x28] sm:$0xff]  }
 0x68f   :  { %v1301_v32 = vpack.c.bf16 %v2782_v39, %v2782_v39 }
 0x691   :  { %1335 = vmatmul.mubr.bf16.vlgmr.msra.gmra.mrb[24].mxu0 %v1301_v32  ;;  %1376 = vmatmul.mubr.bf16.vlgmr.msra.gmra.mrb[56].mxu1 %v1301_v32  ;;  %v1927_v32 = vld [vmem:[#allocation4 + $0x30] sm:$0xff]  }
 0x692   :  { %1414 = vmatpush1.bf16.msra.mxu0 %v2617_v47  ;;  %1455 = vmatpush1.bf16.msra.mxu1 %v2074_v29  ;;  %v2078_v47 = vld [vmem:[#allocation2 + $0x48] ss:$16 sps:$4 sm:$0xff]   ;;  %v1525_v29 = vpack.c.bf16 %v2782_v39, %v2737_v34 }
 0x693   :  { %1415 = vmatprep.subr.bf16.mxu0 %v2621_v45  ;;  %1456 = vmatprep.subr.bf16.mxu1 %v2075_v30  ;;  %v2079_v45 = vld [vmem:[#allocation2 + $0x6c] ss:$16 sps:$4 sm:$0xff]  }
 0x694   :  { %1445 = vmatprep.mubr.bf16.mxu0 %v2881_v50  ;;  %1486 = vmatprep.mubr.bf16.mxu1 %v2881_v50  ;;  %v2081_v50 = vld [vmem:[#allocation2 + $0x8c] ss:$16 sps:$4 sm:$0xff]  }
 0x696   :  { %1416 = vmatpush1.bf16.msra.mxu0 %v2627_v19  ;;  %1457 = vmatpush1.bf16.msra.mxu1 %v2076_v11  ;;  %v2082_v19 = vld [vmem:[#allocation2 + $0x88] ss:$16 sps:$4 sm:$0xff]  }
 0x697   :  { %1417 = vmatprep.subr.bf16.mxu0 %v2631_v4  ;;  %1458 = vmatprep.subr.bf16.mxu1 %v2077_v13  ;;  %v2083_v4 = vld [vmem:[#allocation2 + $0xac] ss:$16 sps:$4 sm:$0xff]  }
 0x698   :  { %v2896_v13 = vld [vmem:[#allocation15_spill] sm:$0xff] }
 0x69a   :  { %1418 = vmatpush1.bf16.msra.mxu0 %v2635_v7  ;;  %1459 = vmatpush1.bf16.msra.mxu1 %v2078_v47  ;;  %v2084_v7 = vld [vmem:[#allocation2 + $0xa8] ss:$16 sps:$4 sm:$0xff]  }
 0x69b   :  { %1419 = vmatprep.subr.bf16.mxu0 %v2639_v8  ;;  %1460 = vmatprep.subr.bf16.mxu1 %v2079_v45  ;;  %v2085_v8 = vld [vmem:[#allocation2 + $0xcc] ss:$16 sps:$4 sm:$0xff]   ;;  %v2897_v45 = vld [vmem:[#allocation24_spill] sm:$0xff] }
 0x69e   :  { %1420 = vmatpush1.bf16.msra.mxu0 %v2691_v15  ;;  %1461 = vmatpush1.bf16.msra.mxu1 %v2080_v33  ;;  %v2086_v15 = vld [vmem:[#allocation2 + $0xc8] ss:$16 sps:$4 sm:$0xff]  }
 0x69f   :  { %1421 = vmatprep.subr.bf16.mxu0 %v2695_v24  ;;  %1462 = vmatprep.subr.bf16.mxu1 %v2081_v50  ;;  %v2087_v24 = vld [vmem:[#allocation2 + $0xec] ss:$16 sps:$4 sm:$0xff]  }
 0x6a2   :  { %1422 = vmatpush1.bf16.msra.mxu0 %v2699_v51  ;;  %1463 = vmatpush1.bf16.msra.mxu1 %v2082_v19  ;;  %v2088_v51 = vld [vmem:[#allocation2 + $0xe8] ss:$16 sps:$4 sm:$0xff]  }
 0x6a3   :  { %1423 = vmatprep.subr.bf16.mxu0 %v2703_v36  ;;  %1464 = vmatprep.subr.bf16.mxu1 %v2083_v4  ;;  %v1921_v36 = vld [vmem:[#allocation4] sm:$0xff]  }
 0x6a4   :  { %v2898_v4 = vld [vmem:[#allocation16_spill] sm:$0xff] }
 0x6a6   :  { %1424 = vmatpush1.bf16.msra.mxu0 %v2707_v18  ;;  %1465 = vmatpush1.bf16.msra.mxu1 %v2084_v7 }
 0x6a7   :  { %1425 = vmatprep.subr.bf16.mxu0 %v2711_v21  ;;  %1466 = vmatprep.subr.bf16.mxu1 %v2085_v8  ;;  %v2899_v8 = vld [vmem:[#allocation25_spill] sm:$0xff] }
 0x6aa   :  { %1426 = vmatpush1.bf16.msra.mxu0 %v2715_v22  ;;  %1467 = vmatpush1.bf16.msra.mxu1 %v2086_v15 }
 0x6ab   :  { %1427 = vmatprep.subr.bf16.mxu0 %v2719_v25  ;;  %1468 = vmatprep.subr.bf16.mxu1 %v2087_v24 }
 0x6ae   :  { %1428 = vmatpush1.bf16.msra.mxu0 %v2723_v26  ;;  %1469 = vmatpush1.bf16.msra.mxu1 %v2088_v51 }
 0x6af   :  { %1790 = vmatprep.subr.bf16.mxu0 %v1921_v36 }
 0x764   :  { %v1336_v18 = vpop.f32.mrb[24].mxu0  ;;  %v1377_v16 = vpop.f32.mrb[56].mxu1 }
 0x765   :  { %v1384_v21 = vadd.f32 %v1336_v18, %v2892_v14  ;;  %v1386_v55 = vadd.f32 %v1377_v16, %v2893_v54  ;;  %v1338_v56 = vpop.f32.mrb[25].mxu0  ;;  %v1379_v22 = vpop.f32.mrb[57].mxu1 }
 0x766   :  { %v1385_v58 = vadd.f32 %v1338_v56, %v2894_v57  ;;  %v1387_v25 = vadd.f32 %v1379_v22, %v2895_v59  ;;  %v1340_v60 = vpop.f32.mrb[26].mxu0  ;;  %v1381_v61 = vpop.f32.mrb[58].mxu1 }
 0x767   :  { %v1763_v62 = vmul.f32 -1.442695, %v1384_v21  ;;  %v1341_v26 = vpop.f32.mrb[27].mxu0  ;;  %v1382_v63 = vpop.f32.mrb[59].mxu1 }
 0x768   :  { %v1764_v1 = vmul.f32 -1.442695, %v1385_v58  ;;  %v1765_v2 = vmul.f32 -1.442695, %v1387_v25  ;;  %v1769_v25 = vld [vmem:[%s2859_s5] ss:$0 sm:$0xff] }
 0x769   :  { %2025 = vpow2.f32 %v1763_v62 }
 0x76a   :  { %2027 = vpow2.f32 %v1764_v1 }
 0x76b   :  { %2029 = vpow2.f32 %v1765_v2 }
 0x76c   :  { %2031 = vtanh.f32 %v1386_v55 }
 0x773   :  { %v2026_v5 = vpop.eup %2025 }
 0x774   :  { %v2028_v6 = vpop.eup %2027  ;;  %v1391_v38 = vadd.f32 1.0, %v2026_v5 }
 0x775   :  { %v1397_v20 = vadd.f32 1.0, %v2028_v6  ;;  %v2030_v9 = vpop.eup %2029 }
 0x776   :  { %2033 = vrcp.f32 %v1391_v38  ;;  %v2032_v23 = vpop.eup %2031  ;;  %v1404_v27 = vadd.f32 1.0, %v2030_v9 }
 0x777   :  { %2035 = vrcp.f32 %v1397_v20 }
 0x778   :  { %2037 = vrcp.f32 %v1404_v27 }
 0x780   :  { %v2034_v17 = vpop.eup %2033 }
 0x781   :  { %v2036_v40 = vpop.eup %2035  ;;  %v1408_v43 = vmul.f32 %v2034_v17, %v2032_v23 }
 0x782   :  { %v1407_v3 = vmul.f32 %v2036_v40, %v2779_v46  ;;  %v2038_v42 = vpop.eup %2037  ;;  %v1924_v46 = vld [vmem:[#allocation4 + $0x18] sm:$0xff]  }
 0x784   :  { %v2808_v48 = vadd.f32 %v1408_v43, %v1407_v3 }
 0x786   :  { %2039 = vtanh.f32 %v2808_v48 }
 0x790   :  { %v2040_v12 = vpop.eup %2039 }
 0x791   :  { %v2811_v49 = vmul.f32 %v2040_v12, %v2038_v42 }
 0x793   :  { %v1412_v53 = vpack.c.bf16 %v2811_v49, %v2811_v49 }
 0x795   :  { %1446 = vmatmul.mubr.bf16.vlgmr.msra.gmra.mrb[28].mxu0 %v1412_v53  ;;  %1487 = vmatmul.mubr.bf16.vlgmr.msra.gmra.mrb[60].mxu1 %v1412_v53 }
 0x796   :  { %1791 = vmatpush3.bf16.msra.mxu0 %v1921_v36  ;;  %1806 = vmatprep.mubr.bf16.mxu0 %v1523_v44 }
 0x797   :  { %1792 = vmatprep.subr.bf16.mxu0 %v1922_v28 }
 0x79a   :  { %1793 = vmatpush3.bf16.msra.mxu0 %v1922_v28 }
 0x79b   :  { %1794 = vmatprep.subr.bf16.mxu0 %v1923_v37 }
 0x79e   :  { %1795 = vmatpush3.bf16.msra.mxu0 %v1923_v37 }
 0x79f   :  { %1796 = vmatprep.subr.bf16.mxu0 %v1924_v46 }
 0x7a2   :  { %1797 = vmatpush3.bf16.msra.mxu0 %v1924_v46 }
 0x7a3   :  { %1798 = vmatprep.subr.bf16.mxu0 %v1925_v35 }
 0x7a6   :  { %1799 = vmatpush3.bf16.msra.mxu0 %v1925_v35 }
 0x7a7   :  { %1800 = vmatprep.subr.bf16.mxu0 %v1926_v0 }
 0x7aa   :  { %1801 = vmatpush3.bf16.msra.mxu0 %v1926_v0 }
 0x7ab   :  { %1802 = vmatprep.subr.bf16.mxu0 %v1927_v32 }
 0x7ae   :  { %1803 = vmatpush3.bf16.msra.mxu0 %v1927_v32 }
 0x7af   :  { %1804 = vmatprep.subr.bf16.mxu0 %v1928_v52 }
 0x7b2   :  { %1805 = vmatpush3.bf16.msra.mxu0 %v1928_v52 }
 0x7b5   :  { %1807 = vmatmul.mubr.bf16.vlgmr.msra.gmra.mrb[32].mxu0 %v1524_v31 }
 0x7b6   :  { %1810 = vmatprep.mubr.bf16.mxu0 %v1525_v29 }
 0x868   :  { %v1447_v30 = vpop.f32.mrb[28].mxu0  ;;  %v1488_v11 = vpop.f32.mrb[60].mxu1 }
 0x869   :  { %v1495_v47 = vadd.f32 %v1447_v30, %v2896_v13  ;;  %v1497_v33 = vadd.f32 %v1488_v11, %v2897_v45  ;;  %v1449_v50 = vpop.f32.mrb[29].mxu0  ;;  %v1490_v19 = vpop.f32.mrb[61].mxu1 }
 0x86a   :  { %v1496_v7 = vadd.f32 %v1449_v50, %v2898_v4  ;;  %v1498_v15 = vadd.f32 %v1490_v19, %v2899_v8  ;;  %v1451_v24 = vpop.f32.mrb[30].mxu0  ;;  %v1492_v51 = vpop.f32.mrb[62].mxu1 }
 0x86b   :  { %v1766_v10 = vmul.f32 -1.442695, %v1495_v47  ;;  %v1452_v41 = vpop.f32.mrb[31].mxu0  ;;  %v1493_v36 = vpop.f32.mrb[63].mxu1 }
 0x86c   :  { %v1767_v34 = vmul.f32 -1.442695, %v1496_v7  ;;  %v1768_v39 = vmul.f32 -1.442695, %v1498_v15 }
 0x86d   :  { %2041 = vpow2.f32 %v1766_v10 }
 0x86e   :  { %2043 = vpow2.f32 %v1767_v34 }
 0x86f   :  { %2045 = vpow2.f32 %v1768_v39 }
 0x870   :  { %2047 = vtanh.f32 %v1497_v33 }
 0x877   :  { %v2042_v18 = vpop.eup %2041 }
 0x878   :  { %v2044_v16 = vpop.eup %2043  ;;  %v1502_v14 = vadd.f32 1.0, %v2042_v18 }
 0x879   :  { %v1508_v21 = vadd.f32 1.0, %v2044_v16  ;;  %v2046_v54 = vpop.eup %2045 }
 0x87a   :  { %2049 = vrcp.f32 %v1502_v14  ;;  %v2048_v55 = vpop.eup %2047  ;;  %v1515_v58 = vadd.f32 1.0, %v2046_v54 }
 0x87b   :  { %2051 = vrcp.f32 %v1508_v21 }
 0x87c   :  { %2053 = vrcp.f32 %v1515_v58 }
 0x884   :  { %v2050_v56 = vpop.eup %2049 }
 0x885   :  { %v2052_v22 = vpop.eup %2051  ;;  %v1519_v57 = vmul.f32 %v2050_v56, %v2048_v55 }
 0x886   :  { %v1518_v59 = vmul.f32 %v2052_v22, %v2808_v48  ;;  %v2054_v38 = vpop.eup %2053 }
 0x888   :  { %v1808_v60 = vpop.f32.mrb[32].mxu0  ;;  %v1520_v61 = vadd.f32 %v1519_v57, %v1518_v59 }
 0x889   :  { %v1641_v62 = vadd.f32 %v1808_v60, %v1769_v25  ;;  %v1632_v26 = vpop.f32.mrb[33].mxu0 }
 0x88a   :  { %v1633_v63 = vadd.f32 %v1769_v25, %v1632_v26  ;;  %v1809_v1 = vpop.f32.mrb[34].mxu0  ;;  %2055 = vtanh.f32 %v1520_v61 }
 0x88b   :  { %1665 = vst [vmem:[%s2860_s6 + $0x10] sm:$0xff] %v1641_v62  ;;  %v1644_v2 = vadd.f32 %v1809_v1, %v1769_v25  ;;  %v1635_v5 = vpop.f32.mrb[35].mxu0 }
 0x88c   :  { %1663 = vst [vmem:[%s2860_s6] sm:$0xff] %v1633_v63  ;;  %v1636_v6 = vadd.f32 %v1769_v25, %v1635_v5 }
 0x88d   :  { %1666 = vst [vmem:[%s2860_s6 + $0x18] sm:$0xff] %v1644_v2 }
 0x88e   :  { %1664 = vst [vmem:[%s2860_s6 + $0x8] sm:$0xff] %v1636_v6 }
 0x894   :  { %v2056_v20 = vpop.eup %2055 }
 0x895   :  { %v1522_v9 = vmul.f32 %v2056_v20, %v2054_v38 }
 0x897   :  { %v1526_v23 = vpack.c.bf16 %v1522_v9, %v2811_v49 }
 0x899   :  { %1811 = vmatmul.mubr.bf16.gmra.mrb[36].mxu0 %v1526_v23 }
 0x96c   :  { %v1812_v17 = vpop.f32.mrb[36].mxu0 }
 0x96d   :  { %v1657_v40 = vadd.f32 %v1812_v17, %v1769_v25  ;;  %v1648_v43 = vpop.f32.mrb[37].mxu0 }
 0x96e   :  { %v1649_v27 = vadd.f32 %v1769_v25, %v1648_v43  ;;  %v1813_v3 = vpop.f32.mrb[38].mxu0 }
 0x96f   :  { %1669 = vst [vmem:[%s2860_s6 + $0x30] sm:$0xff] %v1657_v40  ;;  %v1660_v48 = vadd.f32 %v1813_v3, %v1769_v25  ;;  %v1651_v42 = vpop.f32.mrb[39].mxu0 }
 0x970   :  { %1667 = vst [vmem:[%s2860_s6 + $0x20] sm:$0xff] %v1649_v27  ;;  %v1652_v12 = vadd.f32 %v1769_v25, %v1651_v42 }
 0x971   :  { %1670 = vst [vmem:[%s2860_s6 + $0x38] sm:$0xff] %v1660_v48 }
 0x972   :  { %1668 = vst [vmem:[%s2860_s6 + $0x28] sm:$0xff] %v1652_v12 }
 0x973   :  { %1675 = vsyncpa [#allocation3], 1 }
 0x974   :  { %1676 = vsyncpa [#allocation5], 1 }

</bundles_post_ra>
